<compile_context>
chip_gen: v7x
topology: tpu7x:2x2x1
jax: 0.10.0
libtpu: 0.0.40
codegen_flags: <defaults>
</compile_context>

<pallas_src>
import functools
import math

import jax
import jax.numpy as jnp
from jax.experimental import pallas as pl
from jax.experimental.pallas import tpu as pltpu

_EPS = 1e-5
_SQRT2 = 1.4142135623730951
_LANE = 128


# ------------------------------ small helpers -------------------------------

def _round_up(v, m):
    return (v + m - 1) // m * m


def _pad2(a, rows, cols):
    r, c = a.shape
    return jnp.pad(a, ((0, rows - r), (0, cols - c)))


def _gelu(x):
    # exact (erf-based) GELU, matching torch.nn.GELU() default
    return 0.5 * x * (1.0 + jax.lax.erf(x / _SQRT2))


def _masked_layernorm(x, gamma, beta, lane_mask, d_real):
    """LayerNorm over the (lane-padded) last dim.

    Padded lanes of `x` may hold garbage; they are masked out of the
    statistics and (because padded gamma/beta are zero) produce 0 output.
    """
    xm = jnp.where(lane_mask, x, 0.0)
    mean = jnp.sum(xm, axis=-1, keepdims=True) * (1.0 / d_real)
    cent = jnp.where(lane_mask, x - mean, 0.0)
    var = jnp.sum(cent * cent, axis=-1, keepdims=True) * (1.0 / d_real)
    return cent * jax.lax.rsqrt(var + _EPS) * gamma + beta


# --------------------------------- kernels -----------------------------------

def _patch_embed_kernel(xp_ref, w_ref, b_ref, o_ref):
    o_ref[...] = (jnp.dot(xp_ref[...], w_ref[...],
                          preferred_element_type=jnp.float32) + b_ref[...])


def _mixer_block_kernel(bt_images, n_patch, d_real,
                        tok_in_ref,
                        ln1g_ref, ln1b_ref, w1t_ref, b1t_ref, w2t_ref, b2t_ref,
                        ln2g_ref, ln2b_ref, w1c_ref, b1c_ref, w2c_ref, b2c_ref,
                        tok_ref):
    d = pl.program_id(1)

    # The resident output block carries the token slab across the depth axis;
    # initialize it from the embedded tokens at the first mixer block.
    @pl.when(d == 0)
    def _():
        tok_ref[...] = tok_in_ref[...]

    rows, dp = tok_ref.shape
    lane_mask = jax.lax.broadcasted_iota(jnp.int32, (1, dp), 1) < d_real

    x = tok_ref[...]                                         # (rows, Dp) f32

    # ---------------- token mixing: x + W2t @ gelu(W1t @ LN(x)) --------------
    y = _masked_layernorm(x, ln1g_ref[...], ln1b_ref[...], lane_mask, d_real)
    y = y.astype(jnp.bfloat16)
    if bt_images == 1:
        h = jnp.dot(w1t_ref[...], y, preferred_element_type=jnp.float32)
        h = _gelu(h + b1t_ref[...]).astype(jnp.bfloat16)     # (Tt, Dp)
        t = (jnp.dot(w2t_ref[...], h, preferred_element_type=jnp.float32)
             + b2t_ref[...])                                 # (N, Dp)
    else:
        # One wide MXU matmul over (N, Bt*Dp) instead of Bt tiny matmuls.
        yt = jnp.transpose(y.reshape(bt_images, n_patch, dp),
                           (1, 0, 2)).reshape(n_patch, bt_images * dp)
        h = jnp.dot(w1t_ref[...], yt, preferred_element_type=jnp.float32)
        h = _gelu(h + b1t_ref[...]).astype(jnp.bfloat16)     # (Tt, Bt*Dp)
        t = (jnp.dot(w2t_ref[...], h, preferred_element_type=jnp.float32)
             + b2t_ref[...])                                 # (N, Bt*Dp)
        t = jnp.transpose(t.reshape(n_patch, bt_images, dp),
                          (1, 0, 2)).reshape(rows, dp)
    x = x + t

    # -------------- channel mixing: x + gelu(LN(x) @ W1c) @ W2c --------------
    y = _masked_layernorm(x, ln2g_ref[...], ln2b_ref[...], lane_mask, d_real)
    y = y.astype(jnp.bfloat16)
    h = jnp.dot(y, w1c_ref[...], preferred_element_type=jnp.float32) + b1c_ref[...]
    h = _gelu(h).astype(jnp.bfloat16)
    x = x + jnp.dot(h, w2c_ref[...], preferred_element_type=jnp.float32) + b2c_ref[...]

    tok_ref[...] = x                                         # carry to next block


def _head_kernel(n_img, n_patch, d_real,
                 tok_ref, g_ref, b_ref, wh_ref, bh_ref, o_ref):
    dp = tok_ref.shape[-1]
    lane_mask = jax.lax.broadcasted_iota(jnp.int32, (1, dp), 1) < d_real
    y = _masked_layernorm(tok_ref[...], g_ref[...], b_ref[...], lane_mask, d_real)
    # mean over patches per image (sublane reduce; no pooling matrix)
    pooled = jnp.concatenate(
        [jnp.sum(y[i * n_patch:(i + 1) * n_patch, :], axis=0, keepdims=True)
         for i in range(n_img)], axis=0) * (1.0 / n_patch)          # (n_img, Dp)
    o_ref[...] = (jnp.dot(pooled.astype(jnp.bfloat16), wh_ref[...],
                          preferred_element_type=jnp.float32) + bh_ref[...])


# ------------------------- VMEM budgeting heuristics -------------------------

def _mixer_vmem_bytes(rows, dp, tt, n, tcp):
    f32, bf16 = 4, 2
    per_step = (2 * rows * dp * f32                    # tok_in + tok_out blocks
                + 4 * dp * f32                         # ln1/ln2 gamma + beta
                + 2 * tt * n * bf16                    # token-mix weights
                + (tt + n) * f32                       # token-mix biases
                + 2 * dp * tcp * bf16                  # channel-mix weights
                + (tcp + dp) * f32)                    # channel-mix biases
    pipelined = 2 * per_step                           # double buffering
    temporaries = rows * tcp * f32 + 6 * rows * dp * f32
    return pipelined + temporaries


def _pick_batch_tile(batch, n, dp, tt, tcp, budget=48 * 1024 * 1024):
    """Largest whole-image batch tile that fits the VMEM budget; prefer >=2
    tiles so the 'parallel' axis can use both TensorCores on v7x."""
    fits = [bt for bt in range(1, batch + 1)
            if batch % bt == 0 and (bt * n) % 8 == 0
            and _mixer_vmem_bytes(bt * n, dp, tt, n, tcp) <= budget]
    if not fits:
        raise ValueError("no batch tile fits the VMEM budget; reduce model dims")
    multi = [bt for bt in fits if batch // bt >= 2]
    return max(multi) if multi else max(fits)


# --------------------------------- wrapper -----------------------------------

def mlp_mixer_forward(x, params, patch_size, dim, num_classes, batch_tile=None):
    B, C, H, W = x.shape
    P = patch_size
    hp, wp = H // P, W // P
    N = hp * wp
    D = dim
    K = C * P * P
    blocks = params["blocks"]
    depth = len(blocks)
    assert depth >= 1
    assert N % 8 == 0, "num_patch must be a multiple of 8"
    # TODO(synk): support N % 8 != 0 by zero-padding the token axis with masking.

    Tt = blocks[0]["w1t"].shape[0]
    Tc = blocks[0]["w1c"].shape[0]

    # lane-dense padded dims (zero padding; masked LN keeps results exact)
    Dp = _round_up(D, _LANE)
    Kp = _round_up(K, _LANE)
    Tcp = _round_up(Tc, _LANE)
    NCP = _round_up(num_classes, _LANE)

    if batch_tile is None:
        batch_tile = _pick_batch_tile(B, N, Dp, Tt, Tcp)
    Bt = batch_tile
    assert B % Bt == 0 and (Bt * N) % 8 == 0
    n_tiles = B // Bt
    R = Bt * N
    BN = B * N

    # ---- patch extraction (Conv2d k=P,s=P == per-patch matmul); relayout glue.
    xp = x.reshape(B, C, hp, P, wp, P).transpose(0, 2, 4, 1, 3, 5).reshape(BN, K)
    xp = _pad2(xp, BN, Kp).astype(jnp.bfloat16)
    pw = _pad2(params["conv_w"].reshape(D, K).T, Kp, Dp).astype(jnp.bfloat16)
    pb = _pad2(params["conv_b"].reshape(1, D), 1, Dp).astype(jnp.float32)

    # ---- per-block parameters stacked along depth (streamed by the grid) ----
    def _stack(fn):
        return jnp.stack([fn(b) for b in blocks])

    ln1g = _stack(lambda b: _pad2(b["ln1_g"].reshape(1, D), 1, Dp)).astype(jnp.float32)
    ln1b = _stack(lambda b: _pad2(b["ln1_b"].reshape(1, D), 1, Dp)).astype(jnp.float32)
    ln2g = _stack(lambda b: _pad2(b["ln2_g"].reshape(1, D), 1, Dp)).astype(jnp.float32)
    ln2b = _stack(lambda b: _pad2(b["ln2_b"].reshape(1, D), 1, Dp)).astype(jnp.float32)
    w1t = _stack(lambda b: b["w1t"]).astype(jnp.bfloat16)                 # (dep,Tt,N)
    b1t = _stack(lambda b: b["b1t"].reshape(Tt, 1)).astype(jnp.float32)   # (dep,Tt,1)
    w2t = _stack(lambda b: b["w2t"]).astype(jnp.bfloat16)                 # (dep,N,Tt)
    b2t = _stack(lambda b: b["b2t"].reshape(N, 1)).astype(jnp.float32)    # (dep,N,1)
    w1c = _stack(lambda b: _pad2(b["w1c"].T, Dp, Tcp)).astype(jnp.bfloat16)
    b1c = _stack(lambda b: _pad2(b["b1c"].reshape(1, Tc), 1, Tcp)).astype(jnp.float32)
    w2c = _stack(lambda b: _pad2(b["w2c"].T, Tcp, Dp)).astype(jnp.bfloat16)
    b2c = _stack(lambda b: _pad2(b["b2c"].reshape(1, D), 1, Dp)).astype(jnp.float32)

    lnfg = _pad2(params["ln_f_g"].reshape(1, D), 1, Dp).astype(jnp.float32)
    lnfb = _pad2(params["ln_f_b"].reshape(1, D), 1, Dp).astype(jnp.float32)
    wh = _pad2(params["head_w"].T, Dp, NCP).astype(jnp.bfloat16)
    bh = _pad2(params["head_b"].reshape(1, num_classes), 1, NCP).astype(jnp.float32)

    # ------------------------- kernel 1: patch embed -------------------------
    tok0 = pl.pallas_call(
        _patch_embed_kernel,
        out_shape=jax.ShapeDtypeStruct((BN, Dp), jnp.float32),
        grid=(n_tiles,),
        in_specs=[
            pl.BlockSpec((R, Kp), lambda i: (i, 0)),
            pl.BlockSpec((Kp, Dp), lambda i: (0, 0)),
            pl.BlockSpec((1, Dp), lambda i: (0, 0)),
        ],
        out_specs=pl.BlockSpec((R, Dp), lambda i: (i, 0)),
        compiler_params=pltpu.CompilerParams(
            dimension_semantics=("parallel",)),
    )(xp, pw, pb)

    # --------------------- kernel 2: fused mixer blocks ----------------------
    vmem_limit = int(min(max(1.3 * _mixer_vmem_bytes(R, Dp, Tt, N, Tcp),
                             16 * 1024 * 1024), 100 * 1024 * 1024))

    def _per_depth(shape2):
        return pl.BlockSpec((None,) + shape2, lambda bt, d: (d, 0, 0))

    mixer = functools.partial(_mixer_block_kernel, Bt, N, D)
    tok = pl.pallas_call(
        mixer,
        out_shape=jax.ShapeDtypeStruct((BN, Dp), jnp.float32),
        grid=(n_tiles, depth),
        in_specs=[
            pl.BlockSpec((R, Dp), lambda bt, d: (bt, 0)),    # embedded tokens
            _per_depth((1, Dp)), _per_depth((1, Dp)),        # ln1 gamma / beta
            _per_depth((Tt, N)), _per_depth((Tt, 1)),        # token-mix W1 / b1
            _per_depth((N, Tt)), _per_depth((N, 1)),         # token-mix W2 / b2
            _per_depth((1, Dp)), _per_depth((1, Dp)),        # ln2 gamma / beta
            _per_depth((Dp, Tcp)), _per_depth((1, Tcp)),     # channel-mix W1^T / b1
            _per_depth((Tcp, Dp)), _per_depth((1, Dp)),      # channel-mix W2^T / b2
        ],
        out_specs=pl.BlockSpec((R, Dp), lambda bt, d: (bt, 0)),
        compiler_params=pltpu.CompilerParams(
            dimension_semantics=("parallel", "arbitrary"),
            vmem_limit_bytes=vmem_limit),
    )(tok0, ln1g, ln1b, w1t, b1t, w2t, b2t,
      ln2g, ln2b, w1c, b1c, w2c, b2c)

    # ----------------- kernel 3: final LN + mean-pool + head -----------------
    Bh = math.gcd(B, 8)                       # images per head grid step
    head = functools.partial(_head_kernel, Bh, N, D)
    logits3 = pl.pallas_call(
        head,
        out_shape=jax.ShapeDtypeStruct((B // Bh, Bh, NCP), jnp.float32),
        grid=(B // Bh,),
        in_specs=[
            pl.BlockSpec((Bh * N, Dp), lambda i: (i, 0)),
            pl.BlockSpec((1, Dp), lambda i: (0, 0)),
            pl.BlockSpec((1, Dp), lambda i: (0, 0)),
            pl.BlockSpec((Dp, NCP), lambda i: (0, 0)),
            pl.BlockSpec((1, NCP), lambda i: (0, 0)),
        ],
        out_specs=pl.BlockSpec((None, Bh, NCP), lambda i: (i, 0, 0)),
        compiler_params=pltpu.CompilerParams(
            dimension_semantics=("parallel",)),
    )(tok, lnfg, lnfb, wh, bh)

    return logits3.reshape(B, NCP)[:, :num_classes]


# ------------------------- pure-JAX reference (check) ------------------------

def _reference_forward(x, params, patch_size, dim, num_classes):
    """Reference with the same bf16-matmul / f32-accumulate numerics."""
    B, C, H, W = x.shape
    P = patch_size
    hp, wp = H // P, W // P
    N = hp * wp
    D = dim
    K = C * P * P

    def ln(v, g, b):
        m = jnp.mean(v, axis=-1, keepdims=True)
        s = jnp.mean(jnp.square(v - m), axis=-1, keepdims=True)
        return (v - m) * jax.lax.rsqrt(s + _EPS) * g + b

    def mm(a, b):
        return jnp.dot(a.astype(jnp.bfloat16), b.astype(jnp.bfloat16),
                       preferred_element_type=jnp.float32)

    xp = x.reshape(B, C, hp, P, wp, P).transpose(0, 2, 4, 1, 3, 5).reshape(B * N, K)
    pw = params["conv_w"].reshape(D, K).T
    tok = (mm(xp, pw) + params["conv_b"]).reshape(B, N, D)

    for blk in params["blocks"]:
        y = ln(tok, blk["ln1_g"], blk["ln1_b"])
        y = jnp.swapaxes(y, 1, 2).reshape(B * D, N)
        h = _gelu(mm(y, blk["w1t"].T) + blk["b1t"])
        z = mm(h, blk["w2t"].T) + blk["b2t"]
        tok = tok + jnp.swapaxes(z.reshape(B, D, N), 1, 2)

        y = ln(tok, blk["ln2_g"], blk["ln2_b"]).reshape(B * N, D)
        h = _gelu(mm(y, blk["w1c"].T) + blk["b1c"])
        z = (mm(h, blk["w2c"].T) + blk["b2c"]).reshape(B, N, D)
        tok = tok + z

    tok = ln(tok, params["ln_f_g"], params["ln_f_b"])
    pooled = jnp.mean(tok, axis=1)
    return mm(pooled, params["head_w"].T) + params["head_b"]


# ----------------------------- parameter setup ------------------------------

def init_params(key, in_channels, dim, num_classes, patch_size, image_size,
                depth, token_dim, channel_dim):
    num_patch = (image_size // patch_size) ** 2
    keys = iter(jax.random.split(key, 4 * depth + 4))

    def w(shape):
        return jax.random.normal(next(keys), shape, jnp.float32) * 0.02

    params = {
        "conv_w": w((dim, in_channels, patch_size, patch_size)),
        "conv_b": jnp.zeros((dim,), jnp.float32),
        "ln_f_g": jnp.ones((dim,), jnp.float32),
        "ln_f_b": jnp.zeros((dim,), jnp.float32),
        "head_w": w((num_classes, dim)),            # PyTorch Linear layout
        "head_b": jnp.zeros((num_classes,), jnp.float32),
        "blocks": [],
    }
    for _ in range(depth):
        params["blocks"].append({
            "ln1_g": jnp.ones((dim,), jnp.float32),
            "ln1_b": jnp.zeros((dim,), jnp.float32),
            "w1t": w((token_dim, num_patch)),       # Linear(num_patch, token_dim)
            "b1t": jnp.zeros((token_dim,), jnp.float32),
            "w2t": w((num_patch, token_dim)),       # Linear(token_dim, num_patch)
            "b2t": jnp.zeros((num_patch,), jnp.float32),
            "ln2_g": jnp.ones((dim,), jnp.float32),
            "ln2_b": jnp.zeros((dim,), jnp.float32),
            "w1c": w((channel_dim, dim)),           # Linear(dim, channel_dim)
            "b1c": jnp.zeros((channel_dim,), jnp.float32),
            "w2c": w((dim, channel_dim)),           # Linear(channel_dim, dim)
            "b2c": jnp.zeros((dim,), jnp.float32),
        })
    return params


if __name__ == "__main__":
    # small config consistent with the module's forward
    in_channels, dim, num_classes = 3, 32, 10
    patch_size, image_size = 4, 16
    depth, token_dim, channel_dim = 2, 16, 64
    batch = 2

    key = jax.random.PRNGKey(0)
    k_x, k_p = jax.random.split(key)
    x = jax.random.normal(k_x, (batch, in_channels, image_size, image_size),
                          jnp.float32)
    params = init_params(k_p, in_channels, dim, num_classes, patch_size,
                         image_size, depth, token_dim, channel_dim)

    fwd = jax.jit(functools.partial(mlp_mixer_forward, patch_size=patch_size,
                                    dim=dim, num_classes=num_classes))
    logits = fwd(x, params)
    jax.block_until_ready(logits)
    assert logits.shape == (batch, num_classes)

    ref = _reference_forward(x, params, patch_size, dim, num_classes)
    err = float(jnp.max(jnp.abs(logits - ref)))
    assert err < 2e-3, f"max abs err vs reference: {err}"
    print("KERNEL_OK")
</pallas_src>

<mosaic_0001>
module attributes {stable_mosaic.version = 11 : i64} {
  func.func @_patch_embed_kernel(%arg0: i32, %arg1: memref<16x128xbf16, #tpu.memory_space<vmem>>, %arg2: memref<128x128xbf16, #tpu.memory_space<vmem>>, %arg3: memref<1x128xf32, #tpu.memory_space<vmem>>, %arg4: memref<16x128xf32, #tpu.memory_space<vmem>>) attributes {dimension_semantics = [#tpu.dimension_semantics<parallel>], iteration_bounds = array<i64: 2>, scalar_prefetch = 0 : i64, scratch_operands = 0 : i64, tpu.core_type = #tpu.core_type<tc>, window_params = [{transform_indices = @transform_0, window_bounds = array<i64: 16, 128>}, {pipeline_mode = #tpu.pipeline_mode<synchronous>, transform_indices = @transform_1, window_bounds = array<i64: 128, 128>}, {pipeline_mode = #tpu.pipeline_mode<synchronous>, transform_indices = @transform_2, window_bounds = array<i64: 1, 128>}, {transform_indices = @transform_3, window_bounds = array<i64: 16, 128>}]} {
    %c0 = arith.constant 0 : index
    %c0_0 = arith.constant 0 : index
    %0 = vector.load %arg1[%c0, %c0_0] : memref<16x128xbf16, #tpu.memory_space<vmem>>, vector<16x128xbf16>
    %c0_1 = arith.constant 0 : index
    %c0_2 = arith.constant 0 : index
    %1 = vector.load %arg2[%c0_1, %c0_2] : memref<128x128xbf16, #tpu.memory_space<vmem>>, vector<128x128xbf16>
    %cst = arith.constant dense<0.000000e+00> : vector<16x128xf32>
    %2 = tpu.matmul %0, %1, %cst {dimension_numbers = #tpu.dot_dimension_numbers<[1], [0], [0], [1], [0, 0, 1, 1], [], []>} : vector<16x128xbf16>, vector<128x128xbf16>, vector<16x128xf32> -> vector<16x128xf32>
    %c0_3 = arith.constant 0 : index
    %c0_4 = arith.constant 0 : index
    %3 = vector.load %arg3[%c0_3, %c0_4] : memref<1x128xf32, #tpu.memory_space<vmem>>, vector<1x128xf32>
    %4 = vector.broadcast %3 : vector<1x128xf32> to vector<16x128xf32>
    %5 = arith.addf %2, %4 : vector<16x128xf32>
    %c0_5 = arith.constant 0 : index
    %c0_6 = arith.constant 0 : index
    %6 = vector.load %arg4[%c0_5, %c0_6] : memref<16x128xf32, #tpu.memory_space<vmem>>, vector<16x128xf32>
    tpu.vector_store %arg4[%c0_5, %c0_6], %5 {strides = array<i32>} : memref<16x128xf32, #tpu.memory_space<vmem>>, vector<16x128xf32>,
    return
  }
  func.func @transform_0(%arg0: i32) -> (i32, i32) {
    %c0_i32 = arith.constant 0 : i32
    %c0_i32_0 = arith.constant 0 : i32
    return %arg0, %c0_i32 : i32, i32
  }
  func.func @transform_1(%arg0: i32) -> (i32, i32) {
    %c0_i32 = arith.constant 0 : i32
    %c0_i32_0 = arith.constant 0 : i32
    %c0_i32_1 = arith.constant 0 : i32
    return %c0_i32, %c0_i32_0 : i32, i32
  }
  func.func @transform_2(%arg0: i32) -> (i32, i32) {
    %c0_i32 = arith.constant 0 : i32
    %c0_i32_0 = arith.constant 0 : i32
    %c0_i32_1 = arith.constant 0 : i32
    return %c0_i32, %c0_i32_0 : i32, i32
  }
  func.func @transform_3(%arg0: i32) -> (i32, i32) {
    %c0_i32 = arith.constant 0 : i32
    %c0_i32_0 = arith.constant 0 : i32
    return %arg0, %c0_i32 : i32, i32
  }
}

module attributes {stable_mosaic.version = 11 : i64} {
  func.func @_mixer_block_kernel(%arg0: i32, %arg1: i32, %arg2: memref<16x128xf32, #tpu.memory_space<vmem>>, %arg3: memref<1x1x128xf32, #tpu.memory_space<vmem>>, %arg4: memref<1x1x128xf32, #tpu.memory_space<vmem>>, %arg5: memref<1x16x16xbf16, #tpu.memory_space<vmem>>, %arg6: memref<1x16x1xf32, #tpu.memory_space<vmem>>, %arg7: memref<1x16x16xbf16, #tpu.memory_space<vmem>>, %arg8: memref<1x16x1xf32, #tpu.memory_space<vmem>>, %arg9: memref<1x1x128xf32, #tpu.memory_space<vmem>>, %arg10: memref<1x1x128xf32, #tpu.memory_space<vmem>>, %arg11: memref<1x128x128xbf16, #tpu.memory_space<vmem>>, %arg12: memref<1x1x128xf32, #tpu.memory_space<vmem>>, %arg13: memref<1x128x128xbf16, #tpu.memory_space<vmem>>, %arg14: memref<1x1x128xf32, #tpu.memory_space<vmem>>, %arg15: memref<16x128xf32, #tpu.memory_space<vmem>>) attributes {dimension_semantics = [#tpu.dimension_semantics<parallel>, #tpu.dimension_semantics<arbitrary>], iteration_bounds = array<i64: 2, 2>, scalar_prefetch = 0 : i64, scratch_operands = 0 : i64, tpu.core_type = #tpu.core_type<tc>, window_params = [{transform_indices = @transform_0, window_bounds = array<i64: 16, 128>}, {transform_indices = @transform_1, window_bounds = array<i64: 1, 1, 128>}, {transform_indices = @transform_2, window_bounds = array<i64: 1, 1, 128>}, {transform_indices = @transform_3, window_bounds = array<i64: 1, 16, 16>}, {transform_indices = @transform_4, window_bounds = array<i64: 1, 16, 1>}, {transform_indices = @transform_5, window_bounds = array<i64: 1, 16, 16>}, {transform_indices = @transform_6, window_bounds = array<i64: 1, 16, 1>}, {transform_indices = @transform_7, window_bounds = array<i64: 1, 1, 128>}, {transform_indices = @transform_8, window_bounds = array<i64: 1, 1, 128>}, {transform_indices = @transform_9, window_bounds = array<i64: 1, 128, 128>}, {transform_indices = @transform_10, window_bounds = array<i64: 1, 1, 128>}, {transform_indices = @transform_11, window_bounds = array<i64: 1, 128, 128>}, {transform_indices = @transform_12, window_bounds = array<i64: 1, 1, 128>}, {transform_indices = @transform_13, window_bounds = array<i64: 16, 128>}]} {
    %c0_i32 = arith.constant 0 : i32
    %0 = arith.cmpi eq, %arg1, %c0_i32 : i32
    %1 = arith.extui %0 : i1 to i32
    %c0_i32_0 = arith.constant 0 : i32
    %2 = arith.cmpi ne, %1, %c0_i32_0 : i32
    scf.if %2 {
      %c0_63 = arith.constant 0 : index
      %c0_64 = arith.constant 0 : index
      %122 = vector.load %arg2[%c0_63, %c0_64] : memref<16x128xf32, #tpu.memory_space<vmem>>, vector<16x128xf32>
      %c0_65 = arith.constant 0 : index
      %c0_66 = arith.constant 0 : index
      %123 = vector.load %arg15[%c0_65, %c0_66] : memref<16x128xf32, #tpu.memory_space<vmem>>, vector<16x128xf32>
      tpu.vector_store %arg15[%c0_65, %c0_66], %122 {strides = array<i32>} : memref<16x128xf32, #tpu.memory_space<vmem>>, vector<16x128xf32>,
    } else {
    }
    %3 = tpu.iota {dimensions = array<i32: 1>} : vector<1x128xi32>
    %c32_i32 = arith.constant 32 : i32
    %4 = vector.broadcast %c32_i32 : i32 to vector<1x128xi32>
    %5 = arith.cmpi slt, %3, %4 : vector<1x128xi32>
    %c0 = arith.constant 0 : index
    %c0_1 = arith.constant 0 : index
    %6 = vector.load %arg15[%c0, %c0_1] : memref<16x128xf32, #tpu.memory_space<vmem>>, vector<16x128xf32>
    %c0_2 = arith.constant 0 : index
    %c0_3 = arith.constant 0 : index
    %c0_4 = arith.constant 0 : index
    %7 = vector.load %arg3[%c0_2, %c0_3, %c0_4] : memref<1x1x128xf32, #tpu.memory_space<vmem>>, vector<1x1x128xf32>
    %8 = vector.shape_cast %7 : vector<1x1x128xf32> to vector<1x128xf32>
    %c0_5 = arith.constant 0 : index
    %c0_6 = arith.constant 0 : index
    %c0_7 = arith.constant 0 : index
    %9 = vector.load %arg4[%c0_5, %c0_6, %c0_7] : memref<1x1x128xf32, #tpu.memory_space<vmem>>, vector<1x1x128xf32>
    %10 = vector.shape_cast %9 : vector<1x1x128xf32> to vector<1x128xf32>
    %cst = arith.constant 0.000000e+00 : f32
    %11 = vector.shape_cast %5 : vector<1x128xi1> to vector<1x128xi1>
    %12 = vector.broadcast %11 : vector<1x128xi1> to vector<16x128xi1>
    %13 = vector.broadcast %cst : f32 to vector<16x128xf32>
    %14 = arith.select %12, %6, %13 : vector<16x128xi1>, vector<16x128xf32>
    %cst_8 = arith.constant dense<0.000000e+00> : vector<16xf32>
    %15 = vector.multi_reduction <add>, %14, %cst_8 [1] : vector<16x128xf32> to vector<16xf32>
    %16 = vector.shape_cast %15 : vector<16xf32> to vector<16x1xf32>
    %cst_9 = arith.constant 3.125000e-02 : f32
    %17 = vector.broadcast %cst_9 : f32 to vector<16x1xf32>
    %18 = arith.mulf %16, %17 : vector<16x1xf32>
    %19 = vector.broadcast %18 : vector<16x1xf32> to vector<16x128xf32>
    %20 = arith.subf %6, %19 : vector<16x128xf32>
    %cst_10 = arith.constant 0.000000e+00 : f32
    %21 = vector.shape_cast %5 : vector<1x128xi1> to vector<1x128xi1>
    %22 = vector.broadcast %21 : vector<1x128xi1> to vector<16x128xi1>
    %23 = vector.broadcast %cst_10 : f32 to vector<16x128xf32>
    %24 = arith.select %22, %20, %23 : vector<16x128xi1>, vector<16x128xf32>
    %25 = arith.mulf %24, %24 : vector<16x128xf32>
    %cst_11 = arith.constant dense<0.000000e+00> : vector<16xf32>
    %26 = vector.multi_reduction <add>, %25, %cst_11 [1] : vector<16x128xf32> to vector<16xf32>
    %27 = vector.shape_cast %26 : vector<16xf32> to vector<16x1xf32>
    %cst_12 = arith.constant 3.125000e-02 : f32
    %28 = vector.broadcast %cst_12 : f32 to vector<16x1xf32>
    %29 = arith.mulf %27, %28 : vector<16x1xf32>
    %cst_13 = arith.constant 9.99999974E-6 : f32
    %30 = vector.broadcast %cst_13 : f32 to vector<16x1xf32>
    %31 = arith.addf %29, %30 : vector<16x1xf32>
    %32 = math.rsqrt %31 : vector<16x1xf32>
    %33 = vector.broadcast %32 : vector<16x1xf32> to vector<16x128xf32>
    %34 = arith.mulf %24, %33 : vector<16x128xf32>
    %35 = vector.broadcast %8 : vector<1x128xf32> to vector<16x128xf32>
    %36 = arith.mulf %34, %35 : vector<16x128xf32>
    %37 = vector.broadcast %10 : vector<1x128xf32> to vector<16x128xf32>
    %38 = arith.addf %36, %37 : vector<16x128xf32>
    %39 = arith.truncf %38 : vector<16x128xf32> to vector<16x128xbf16>
    %c0_14 = arith.constant 0 : index
    %c0_15 = arith.constant 0 : index
    %c0_16 = arith.constant 0 : index
    %40 = vector.load %arg5[%c0_14, %c0_15, %c0_16] : memref<1x16x16xbf16, #tpu.memory_space<vmem>>, vector<1x16x16xbf16>
    %41 = vector.shape_cast %40 : vector<1x16x16xbf16> to vector<16x16xbf16>
    %cst_17 = arith.constant dense<0.000000e+00> : vector<16x128xf32>
    %42 = tpu.matmul %41, %39, %cst_17 {dimension_numbers = #tpu.dot_dimension_numbers<[1], [0], [0], [1], [0, 0, 1, 1], [], []>} : vector<16x16xbf16>, vector<16x128xbf16>, vector<16x128xf32> -> vector<16x128xf32>
    %c0_18 = arith.constant 0 : index
    %c0_19 = arith.constant 0 : index
    %c0_20 = arith.constant 0 : index
    %43 = vector.load %arg6[%c0_18, %c0_19, %c0_20] : memref<1x16x1xf32, #tpu.memory_space<vmem>>, vector<1x16x1xf32>
    %44 = vector.shape_cast %43 : vector<1x16x1xf32> to vector<16x1xf32>
    %45 = vector.broadcast %44 : vector<16x1xf32> to vector<16x128xf32>
    %46 = arith.addf %42, %45 : vector<16x128xf32>
    %cst_21 = arith.constant 5.000000e-01 : f32
    %47 = vector.broadcast %cst_21 : f32 to vector<16x128xf32>
    %48 = arith.mulf %47, %46 : vector<16x128xf32>
    %cst_22 = arith.constant 1.41421354 : f32
    %49 = vector.broadcast %cst_22 : f32 to vector<16x128xf32>
    %50 = arith.divf %46, %49 : vector<16x128xf32>
    %51 = math.erf %50 : vector<16x128xf32>
    %cst_23 = arith.constant 1.000000e+00 : f32
    %52 = vector.broadcast %cst_23 : f32 to vector<16x128xf32>
    %53 = arith.addf %52, %51 : vector<16x128xf32>
    %54 = arith.mulf %48, %53 : vector<16x128xf32>
    %55 = arith.truncf %54 : vector<16x128xf32> to vector<16x128xbf16>
    %c0_24 = arith.constant 0 : index
    %c0_25 = arith.constant 0 : index
    %c0_26 = arith.constant 0 : index
    %56 = vector.load %arg7[%c0_24, %c0_25, %c0_26] : memref<1x16x16xbf16, #tpu.memory_space<vmem>>, vector<1x16x16xbf16>
    %57 = vector.shape_cast %56 : vector<1x16x16xbf16> to vector<16x16xbf16>
    %cst_27 = arith.constant dense<0.000000e+00> : vector<16x128xf32>
    %58 = tpu.matmul %57, %55, %cst_27 {dimension_numbers = #tpu.dot_dimension_numbers<[1], [0], [0], [1], [0, 0, 1, 1], [], []>} : vector<16x16xbf16>, vector<16x128xbf16>, vector<16x128xf32> -> vector<16x128xf32>
    %c0_28 = arith.constant 0 : index
    %c0_29 = arith.constant 0 : index
    %c0_30 = arith.constant 0 : index
    %59 = vector.load %arg8[%c0_28, %c0_29, %c0_30] : memref<1x16x1xf32, #tpu.memory_space<vmem>>, vector<1x16x1xf32>
    %60 = vector.shape_cast %59 : vector<1x16x1xf32> to vector<16x1xf32>
    %61 = vector.broadcast %60 : vector<16x1xf32> to vector<16x128xf32>
    %62 = arith.addf %58, %61 : vector<16x128xf32>
    %63 = arith.addf %6, %62 : vector<16x128xf32>
    %c0_31 = arith.constant 0 : index
    %c0_32 = arith.constant 0 : index
    %c0_33 = arith.constant 0 : index
    %64 = vector.load %arg9[%c0_31, %c0_32, %c0_33] : memref<1x1x128xf32, #tpu.memory_space<vmem>>, vector<1x1x128xf32>
    %65 = vector.shape_cast %64 : vector<1x1x128xf32> to vector<1x128xf32>
    %c0_34 = arith.constant 0 : index
    %c0_35 = arith.constant 0 : index
    %c0_36 = arith.constant 0 : index
    %66 = vector.load %arg10[%c0_34, %c0_35, %c0_36] : memref<1x1x128xf32, #tpu.memory_space<vmem>>, vector<1x1x128xf32>
    %67 = vector.shape_cast %66 : vector<1x1x128xf32> to vector<1x128xf32>
    %cst_37 = arith.constant 0.000000e+00 : f32
    %68 = vector.shape_cast %5 : vector<1x128xi1> to vector<1x128xi1>
    %69 = vector.broadcast %68 : vector<1x128xi1> to vector<16x128xi1>
    %70 = vector.broadcast %cst_37 : f32 to vector<16x128xf32>
    %71 = arith.select %69, %63, %70 : vector<16x128xi1>, vector<16x128xf32>
    %cst_38 = arith.constant dense<0.000000e+00> : vector<16xf32>
    %72 = vector.multi_reduction <add>, %71, %cst_38 [1] : vector<16x128xf32> to vector<16xf32>
    %73 = vector.shape_cast %72 : vector<16xf32> to vector<16x1xf32>
    %cst_39 = arith.constant 3.125000e-02 : f32
    %74 = vector.broadcast %cst_39 : f32 to vector<16x1xf32>
    %75 = arith.mulf %73, %74 : vector<16x1xf32>
    %76 = vector.broadcast %75 : vector<16x1xf32> to vector<16x128xf32>
    %77 = arith.subf %63, %76 : vector<16x128xf32>
    %cst_40 = arith.constant 0.000000e+00 : f32
    %78 = vector.shape_cast %5 : vector<1x128xi1> to vector<1x128xi1>
    %79 = vector.broadcast %78 : vector<1x128xi1> to vector<16x128xi1>
    %80 = vector.broadcast %cst_40 : f32 to vector<16x128xf32>
    %81 = arith.select %79, %77, %80 : vector<16x128xi1>, vector<16x128xf32>
    %82 = arith.mulf %81, %81 : vector<16x128xf32>
    %cst_41 = arith.constant dense<0.000000e+00> : vector<16xf32>
    %83 = vector.multi_reduction <add>, %82, %cst_41 [1] : vector<16x128xf32> to vector<16xf32>
    %84 = vector.shape_cast %83 : vector<16xf32> to vector<16x1xf32>
    %cst_42 = arith.constant 3.125000e-02 : f32
    %85 = vector.broadcast %cst_42 : f32 to vector<16x1xf32>
    %86 = arith.mulf %84, %85 : vector<16x1xf32>
    %cst_43 = arith.constant 9.99999974E-6 : f32
    %87 = vector.broadcast %cst_43 : f32 to vector<16x1xf32>
    %88 = arith.addf %86, %87 : vector<16x1xf32>
    %89 = math.rsqrt %88 : vector<16x1xf32>
    %90 = vector.broadcast %89 : vector<16x1xf32> to vector<16x128xf32>
    %91 = arith.mulf %81, %90 : vector<16x128xf32>
    %92 = vector.broadcast %65 : vector<1x128xf32> to vector<16x128xf32>
    %93 = arith.mulf %91, %92 : vector<16x128xf32>
    %94 = vector.broadcast %67 : vector<1x128xf32> to vector<16x128xf32>
    %95 = arith.addf %93, %94 : vector<16x128xf32>
    %96 = arith.truncf %95 : vector<16x128xf32> to vector<16x128xbf16>
    %c0_44 = arith.constant 0 : index
    %c0_45 = arith.constant 0 : index
    %c0_46 = arith.constant 0 : index
    %97 = vector.load %arg11[%c0_44, %c0_45, %c0_46] : memref<1x128x128xbf16, #tpu.memory_space<vmem>>, vector<1x128x128xbf16>
    %98 = vector.shape_cast %97 : vector<1x128x128xbf16> to vector<128x128xbf16>
    %cst_47 = arith.constant dense<0.000000e+00> : vector<16x128xf32>
    %99 = tpu.matmul %96, %98, %cst_47 {dimension_numbers = #tpu.dot_dimension_numbers<[1], [0], [0], [1], [0, 0, 1, 1], [], []>} : vector<16x128xbf16>, vector<128x128xbf16>, vector<16x128xf32> -> vector<16x128xf32>
    %c0_48 = arith.constant 0 : index
    %c0_49 = arith.constant 0 : index
    %c0_50 = arith.constant 0 : index
    %100 = vector.load %arg12[%c0_48, %c0_49, %c0_50] : memref<1x1x128xf32, #tpu.memory_space<vmem>>, vector<1x1x128xf32>
    %101 = vector.shape_cast %100 : vector<1x1x128xf32> to vector<1x128xf32>
    %102 = vector.broadcast %101 : vector<1x128xf32> to vector<16x128xf32>
    %103 = arith.addf %99, %102 : vector<16x128xf32>
    %cst_51 = arith.constant 5.000000e-01 : f32
    %104 = vector.broadcast %cst_51 : f32 to vector<16x128xf32>
    %105 = arith.mulf %104, %103 : vector<16x128xf32>
    %cst_52 = arith.constant 1.41421354 : f32
    %106 = vector.broadcast %cst_52 : f32 to vector<16x128xf32>
    %107 = arith.divf %103, %106 : vector<16x128xf32>
    %108 = math.erf %107 : vector<16x128xf32>
    %cst_53 = arith.constant 1.000000e+00 : f32
    %109 = vector.broadcast %cst_53 : f32 to vector<16x128xf32>
    %110 = arith.addf %109, %108 : vector<16x128xf32>
    %111 = arith.mulf %105, %110 : vector<16x128xf32>
    %112 = arith.truncf %111 : vector<16x128xf32> to vector<16x128xbf16>
    %c0_54 = arith.constant 0 : index
    %c0_55 = arith.constant 0 : index
    %c0_56 = arith.constant 0 : index
    %113 = vector.load %arg13[%c0_54, %c0_55, %c0_56] : memref<1x128x128xbf16, #tpu.memory_space<vmem>>, vector<1x128x128xbf16>
    %114 = vector.shape_cast %113 : vector<1x128x128xbf16> to vector<128x128xbf16>
    %cst_57 = arith.constant dense<0.000000e+00> : vector<16x128xf32>
    %115 = tpu.matmul %112, %114, %cst_57 {dimension_numbers = #tpu.dot_dimension_numbers<[1], [0], [0], [1], [0, 0, 1, 1], [], []>} : vector<16x128xbf16>, vector<128x128xbf16>, vector<16x128xf32> -> vector<16x128xf32>
    %116 = arith.addf %63, %115 : vector<16x128xf32>
    %c0_58 = arith.constant 0 : index
    %c0_59 = arith.constant 0 : index
    %c0_60 = arith.constant 0 : index
    %117 = vector.load %arg14[%c0_58, %c0_59, %c0_60] : memref<1x1x128xf32, #tpu.memory_space<vmem>>, vector<1x1x128xf32>
    %118 = vector.shape_cast %117 : vector<1x1x128xf32> to vector<1x128xf32>
    %119 = vector.broadcast %118 : vector<1x128xf32> to vector<16x128xf32>
    %120 = arith.addf %116, %119 : vector<16x128xf32>
    %c0_61 = arith.constant 0 : index
    %c0_62 = arith.constant 0 : index
    %121 = vector.load %arg15[%c0_61, %c0_62] : memref<16x128xf32, #tpu.memory_space<vmem>>, vector<16x128xf32>
    tpu.vector_store %arg15[%c0_61, %c0_62], %120 {strides = array<i32>} : memref<16x128xf32, #tpu.memory_space<vmem>>, vector<16x128xf32>,
    return
  }
  func.func @transform_0(%arg0: i32, %arg1: i32) -> (i32, i32) {
    %c0_i32 = arith.constant 0 : i32
    %c0_i32_0 = arith.constant 0 : i32
    return %arg0, %c0_i32 : i32, i32
  }
  func.func @transform_1(%arg0: i32, %arg1: i32) -> (i32, i32, i32) {
    %c0_i32 = arith.constant 0 : i32
    %c0_i32_0 = arith.constant 0 : i32
    %c0_i32_1 = arith.constant 0 : i32
    return %arg1, %c0_i32, %c0_i32_0 : i32, i32, i32
  }
  func.func @transform_2(%arg0: i32, %arg1: i32) -> (i32, i32, i32) {
    %c0_i32 = arith.constant 0 : i32
    %c0_i32_0 = arith.constant 0 : i32
    %c0_i32_1 = arith.constant 0 : i32
    return %arg1, %c0_i32, %c0_i32_0 : i32, i32, i32
  }
  func.func @transform_3(%arg0: i32, %arg1: i32) -> (i32, i32, i32) {
    %c0_i32 = arith.constant 0 : i32
    %c0_i32_0 = arith.constant 0 : i32
    %c0_i32_1 = arith.constant 0 : i32
    return %arg1, %c0_i32, %c0_i32_0 : i32, i32, i32
  }
  func.func @transform_4(%arg0: i32, %arg1: i32) -> (i32, i32, i32) {
    %c0_i32 = arith.constant 0 : i32
    %c0_i32_0 = arith.constant 0 : i32
    %c0_i32_1 = arith.constant 0 : i32
    return %arg1, %c0_i32, %c0_i32_0 : i32, i32, i32
  }
  func.func @transform_5(%arg0: i32, %arg1: i32) -> (i32, i32, i32) {
    %c0_i32 = arith.constant 0 : i32
    %c0_i32_0 = arith.constant 0 : i32
    %c0_i32_1 = arith.constant 0 : i32
    return %arg1, %c0_i32, %c0_i32_0 : i32, i32, i32
  }
  func.func @transform_6(%arg0: i32, %arg1: i32) -> (i32, i32, i32) {
    %c0_i32 = arith.constant 0 : i32
    %c0_i32_0 = arith.constant 0 : i32
    %c0_i32_1 = arith.constant 0 : i32
    return %arg1, %c0_i32, %c0_i32_0 : i32, i32, i32
  }
  func.func @transform_7(%arg0: i32, %arg1: i32) -> (i32, i32, i32) {
    %c0_i32 = arith.constant 0 : i32
    %c0_i32_0 = arith.constant 0 : i32
    %c0_i32_1 = arith.constant 0 : i32
    return %arg1, %c0_i32, %c0_i32_0 : i32, i32, i32
  }
  func.func @transform_8(%arg0: i32, %arg1: i32) -> (i32, i32, i32) {
    %c0_i32 = arith.constant 0 : i32
    %c0_i32_0 = arith.constant 0 : i32
    %c0_i32_1 = arith.constant 0 : i32
    return %arg1, %c0_i32, %c0_i32_0 : i32, i32, i32
  }
  func.func @transform_9(%arg0: i32, %arg1: i32) -> (i32, i32, i32) {
    %c0_i32 = arith.constant 0 : i32
    %c0_i32_0 = arith.constant 0 : i32
    %c0_i32_1 = arith.constant 0 : i32
    return %arg1, %c0_i32, %c0_i32_0 : i32, i32, i32
  }
  func.func @transform_10(%arg0: i32, %arg1: i32) -> (i32, i32, i32) {
    %c0_i32 = arith.constant 0 : i32
    %c0_i32_0 = arith.constant 0 : i32
    %c0_i32_1 = arith.constant 0 : i32
    return %arg1, %c0_i32, %c0_i32_0 : i32, i32, i32
  }
  func.func @transform_11(%arg0: i32, %arg1: i32) -> (i32, i32, i32) {
    %c0_i32 = arith.constant 0 : i32
    %c0_i32_0 = arith.constant 0 : i32
    %c0_i32_1 = arith.constant 0 : i32
    return %arg1, %c0_i32, %c0_i32_0 : i32, i32, i32
  }
  func.func @transform_12(%arg0: i32, %arg1: i32) -> (i32, i32, i32) {
    %c0_i32 = arith.constant 0 : i32
    %c0_i32_0 = arith.constant 0 : i32
    %c0_i32_1 = arith.constant 0 : i32
    return %arg1, %c0_i32, %c0_i32_0 : i32, i32, i32
  }
  func.func @transform_13(%arg0: i32, %arg1: i32) -> (i32, i32) {
    %c0_i32 = arith.constant 0 : i32
    %c0_i32_0 = arith.constant 0 : i32
    return %arg0, %c0_i32 : i32, i32
  }
}

module attributes {stable_mosaic.version = 11 : i64} {
  func.func @_head_kernel(%arg0: i32, %arg1: memref<32x128xf32, #tpu.memory_space<vmem>>, %arg2: memref<1x128xf32, #tpu.memory_space<vmem>>, %arg3: memref<1x128xf32, #tpu.memory_space<vmem>>, %arg4: memref<128x128xbf16, #tpu.memory_space<vmem>>, %arg5: memref<1x128xf32, #tpu.memory_space<vmem>>, %arg6: memref<1x2x128xf32, #tpu.memory_space<vmem>>) attributes {dimension_semantics = [#tpu.dimension_semantics<parallel>], iteration_bounds = array<i64: 1>, scalar_prefetch = 0 : i64, scratch_operands = 0 : i64, tpu.core_type = #tpu.core_type<tc>, window_params = [{transform_indices = @transform_0, window_bounds = array<i64: 32, 128>}, {pipeline_mode = #tpu.pipeline_mode<synchronous>, transform_indices = @transform_1, window_bounds = array<i64: 1, 128>}, {pipeline_mode = #tpu.pipeline_mode<synchronous>, transform_indices = @transform_2, window_bounds = array<i64: 1, 128>}, {pipeline_mode = #tpu.pipeline_mode<synchronous>, transform_indices = @transform_3, window_bounds = array<i64: 128, 128>}, {pipeline_mode = #tpu.pipeline_mode<synchronous>, transform_indices = @transform_4, window_bounds = array<i64: 1, 128>}, {transform_indices = @transform_5, window_bounds = array<i64: 1, 2, 128>}]} {
    %0 = tpu.iota {dimensions = array<i32: 1>} : vector<1x128xi32>
    %c32_i32 = arith.constant 32 : i32
    %1 = vector.broadcast %c32_i32 : i32 to vector<1x128xi32>
    %2 = arith.cmpi slt, %0, %1 : vector<1x128xi32>
    %c0 = arith.constant 0 : index
    %c0_0 = arith.constant 0 : index
    %3 = vector.load %arg1[%c0, %c0_0] : memref<32x128xf32, #tpu.memory_space<vmem>>, vector<32x128xf32>
    %c0_1 = arith.constant 0 : index
    %c0_2 = arith.constant 0 : index
    %4 = vector.load %arg2[%c0_1, %c0_2] : memref<1x128xf32, #tpu.memory_space<vmem>>, vector<1x128xf32>
    %c0_3 = arith.constant 0 : index
    %c0_4 = arith.constant 0 : index
    %5 = vector.load %arg3[%c0_3, %c0_4] : memref<1x128xf32, #tpu.memory_space<vmem>>, vector<1x128xf32>
    %cst = arith.constant 0.000000e+00 : f32
    %6 = vector.shape_cast %2 : vector<1x128xi1> to vector<1x128xi1>
    %7 = vector.broadcast %6 : vector<1x128xi1> to vector<32x128xi1>
    %8 = vector.broadcast %cst : f32 to vector<32x128xf32>
    %9 = arith.select %7, %3, %8 : vector<32x128xi1>, vector<32x128xf32>
    %cst_5 = arith.constant dense<0.000000e+00> : vector<32xf32>
    %10 = vector.multi_reduction <add>, %9, %cst_5 [1] : vector<32x128xf32> to vector<32xf32>
    %11 = vector.shape_cast %10 : vector<32xf32> to vector<32x1xf32>
    %cst_6 = arith.constant 3.125000e-02 : f32
    %12 = vector.broadcast %cst_6 : f32 to vector<32x1xf32>
    %13 = arith.mulf %11, %12 : vector<32x1xf32>
    %14 = vector.broadcast %13 : vector<32x1xf32> to vector<32x128xf32>
    %15 = arith.subf %3, %14 : vector<32x128xf32>
    %cst_7 = arith.constant 0.000000e+00 : f32
    %16 = vector.shape_cast %2 : vector<1x128xi1> to vector<1x128xi1>
    %17 = vector.broadcast %16 : vector<1x128xi1> to vector<32x128xi1>
    %18 = vector.broadcast %cst_7 : f32 to vector<32x128xf32>
    %19 = arith.select %17, %15, %18 : vector<32x128xi1>, vector<32x128xf32>
    %20 = arith.mulf %19, %19 : vector<32x128xf32>
    %cst_8 = arith.constant dense<0.000000e+00> : vector<32xf32>
    %21 = vector.multi_reduction <add>, %20, %cst_8 [1] : vector<32x128xf32> to vector<32xf32>
    %22 = vector.shape_cast %21 : vector<32xf32> to vector<32x1xf32>
    %cst_9 = arith.constant 3.125000e-02 : f32
    %23 = vector.broadcast %cst_9 : f32 to vector<32x1xf32>
    %24 = arith.mulf %22, %23 : vector<32x1xf32>
    %cst_10 = arith.constant 9.99999974E-6 : f32
    %25 = vector.broadcast %cst_10 : f32 to vector<32x1xf32>
    %26 = arith.addf %24, %25 : vector<32x1xf32>
    %27 = math.rsqrt %26 : vector<32x1xf32>
    %28 = vector.broadcast %27 : vector<32x1xf32> to vector<32x128xf32>
    %29 = arith.mulf %19, %28 : vector<32x128xf32>
    %30 = vector.broadcast %4 : vector<1x128xf32> to vector<32x128xf32>
    %31 = arith.mulf %29, %30 : vector<32x128xf32>
    %32 = vector.broadcast %5 : vector<1x128xf32> to vector<32x128xf32>
    %33 = arith.addf %31, %32 : vector<32x128xf32>
    %34 = vector.extract_strided_slice %33 {offsets = [0, 0], sizes = [16, 128], strides = [1, 1]} : vector<32x128xf32> to vector<16x128xf32>
    %cst_11 = arith.constant dense<0.000000e+00> : vector<128xf32>
    %35 = vector.multi_reduction <add>, %34, %cst_11 [0] : vector<16x128xf32> to vector<128xf32>
    %36 = vector.shape_cast %35 : vector<128xf32> to vector<1x128xf32>
    %37 = vector.extract_strided_slice %33 {offsets = [16, 0], sizes = [16, 128], strides = [1, 1]} : vector<32x128xf32> to vector<16x128xf32>
    %cst_12 = arith.constant dense<0.000000e+00> : vector<128xf32>
    %38 = vector.multi_reduction <add>, %37, %cst_12 [0] : vector<16x128xf32> to vector<128xf32>
    %39 = vector.shape_cast %38 : vector<128xf32> to vector<1x128xf32>
    %40 = tpu.concatenate %36, %39 in 0 : vector<1x128xf32>, vector<1x128xf32> -> vector<2x128xf32>
    %cst_13 = arith.constant 6.250000e-02 : f32
    %41 = vector.broadcast %cst_13 : f32 to vector<2x128xf32>
    %42 = arith.mulf %40, %41 : vector<2x128xf32>
    %43 = arith.truncf %42 : vector<2x128xf32> to vector<2x128xbf16>
    %c0_14 = arith.constant 0 : index
    %c0_15 = arith.constant 0 : index
    %44 = vector.load %arg4[%c0_14, %c0_15] : memref<128x128xbf16, #tpu.memory_space<vmem>>, vector<128x128xbf16>
    %cst_16 = arith.constant dense<0.000000e+00> : vector<2x128xf32>
    %45 = tpu.matmul %43, %44, %cst_16 {dimension_numbers = #tpu.dot_dimension_numbers<[1], [0], [0], [1], [0, 0, 1, 1], [], []>} : vector<2x128xbf16>, vector<128x128xbf16>, vector<2x128xf32> -> vector<2x128xf32>
    %c0_17 = arith.constant 0 : index
    %c0_18 = arith.constant 0 : index
    %46 = vector.load %arg5[%c0_17, %c0_18] : memref<1x128xf32, #tpu.memory_space<vmem>>, vector<1x128xf32>
    %47 = vector.broadcast %46 : vector<1x128xf32> to vector<2x128xf32>
    %48 = arith.addf %45, %47 : vector<2x128xf32>
    %c0_19 = arith.constant 0 : index
    %c0_20 = arith.constant 0 : index
    %c0_21 = arith.constant 0 : index
    %49 = vector.load %arg6[%c0_19, %c0_20, %c0_21] : memref<1x2x128xf32, #tpu.memory_space<vmem>>, vector<1x2x128xf32>
    %50 = vector.shape_cast %49 : vector<1x2x128xf32> to vector<2x128xf32>
    %51 = vector.shape_cast %48 : vector<2x128xf32> to vector<1x2x128xf32>
    tpu.vector_store %arg6[%c0_19, %c0_20, %c0_21], %51 {strides = array<i32>} : memref<1x2x128xf32, #tpu.memory_space<vmem>>, vector<1x2x128xf32>,
    return
  }
  func.func @transform_0(%arg0: i32) -> (i32, i32) {
    %c0_i32 = arith.constant 0 : i32
    %c0_i32_0 = arith.constant 0 : i32
    return %arg0, %c0_i32 : i32, i32
  }
  func.func @transform_1(%arg0: i32) -> (i32, i32) {
    %c0_i32 = arith.constant 0 : i32
    %c0_i32_0 = arith.constant 0 : i32
    %c0_i32_1 = arith.constant 0 : i32
    return %c0_i32, %c0_i32_0 : i32, i32
  }
  func.func @transform_2(%arg0: i32) -> (i32, i32) {
    %c0_i32 = arith.constant 0 : i32
    %c0_i32_0 = arith.constant 0 : i32
    %c0_i32_1 = arith.constant 0 : i32
    return %c0_i32, %c0_i32_0 : i32, i32
  }
  func.func @transform_3(%arg0: i32) -> (i32, i32) {
    %c0_i32 = arith.constant 0 : i32
    %c0_i32_0 = arith.constant 0 : i32
    %c0_i32_1 = arith.constant 0 : i32
    return %c0_i32, %c0_i32_0 : i32, i32
  }
  func.func @transform_4(%arg0: i32) -> (i32, i32) {
    %c0_i32 = arith.constant 0 : i32
    %c0_i32_0 = arith.constant 0 : i32
    %c0_i32_1 = arith.constant 0 : i32
    return %c0_i32, %c0_i32_0 : i32, i32
  }
  func.func @transform_5(%arg0: i32) -> (i32, i32, i32) {
    %c0_i32 = arith.constant 0 : i32
    %c0_i32_0 = arith.constant 0 : i32
    %c0_i32_1 = arith.constant 0 : i32
    return %arg0, %c0_i32, %c0_i32_0 : i32, i32, i32
  }
}

</mosaic_0001>

<bundles_post_ra>
// kernel: mlp_mixer_forward.3
= control target key start
LH: loop header
LB: loop body
LE: loop exit
PB: predicated region body
PF: predicated region fallthrough
CT: control target
= control target key end

     0   :  { %s452_s12 = smov 0   ;;  %s496_s0 = inlined_call_operand.vmem [shape: bf16[32,128], index: 0, kind: input, shape index: {}]   ;;  %s497_s1 = inlined_call_operand.vmem [shape: bf16[128,128], index: 1, kind: input, shape index: {}]   ;;  %s498_s2 = inlined_call_operand.vmem [shape: f32[1,128], index: 2, kind: input, shape index: {}]   ;;  %s499_s3 = inlined_call_operand.vmem [shape: f32[32,128], index: 3, kind: output, shape index: {}]  }
   0x1 LB: > { %s353_s13 = sadd.s32 4294967295, %s428_s12   ;;  %p357_p0 = scmp.ge.s32.totalorder %s428_s12, 1  ;;  %s428_s12 = sphi %s452_s12, %s13_s12  }
   0x2   : > { %p138_p1 = scmp.lt.s32.totalorder %s428_s12, 3 }
   0x4   : > { %p139_p2 = pnand %p357_p0, %p138_p1 }
   0x5   : > { %v413_v0 = vld [vmem:[%s497_s1] sm:$0xff] (!%p139_p2)   ;;  %v430_v1 = vmov (!%p139_p2), 0.0   ;;  %v414_v2 = vld [vmem:[%s497_s1 + $0x8] sm:$0xff] (!%p139_p2)   ;;  %vm431_vm0 = vmmov (!%p139_p2), 0   ;;  %s358_s18 = sshll.u32 (!%p139_p2), %s353_s13, 1  ;;  %v415_v3 = vld [vmem:[%s497_s1 + $0x10] sm:$0xff] (!%p139_p2)  }
   0x6   : > { %142 = sbr.rel (%p139_p2) target bundleno = 255 (0xff), region = 32  ;;  %383 = vmatprep.subr.bf16.mxu0 (!%p139_p2), %v430_v1  ;;  %399 = vmatprep.mubr.msk.bf16.mxu0 (!%p139_p2), %vm431_vm0, %v430_v1  ;;  %p163_p3 = scmp.lt.s32.totalorder (!%p139_p2), %s358_s18, 3  ;;  %v416_v4 = vld [vmem:[%s497_s1 + $0x18] sm:$0xff] (!%p139_p2)   ;;  %v417_v5 = vld [vmem:[%s497_s1 + $0x20] sm:$0xff] (!%p139_p2)   ;;  %v418_v6 = vld [vmem:[%s497_s1 + $0x28] sm:$0xff] (!%p139_p2)  }
   0x7   : > { %384 = vmatpush3.bf16.msra.mxu0 (!%p139_p2), %v413_v0  ;;  %v419_v7 = vld [vmem:[%s497_s1 + $0x30] sm:$0xff] (!%p139_p2)   ;;  %v420_v8 = vld [vmem:[%s497_s1 + $0x38] sm:$0xff] (!%p139_p2)   ;;  %v362_v10 = vld [vmem:[%s498_s2] ss:$0 sm:$0xff] (!%p139_p2) }
   0x8   : > { %385 = vmatprep.subr.bf16.mxu0 (!%p139_p2), %v430_v1 }
   0xb   : > { %386 = vmatpush3.bf16.msra.mxu0 (!%p139_p2), %v414_v2 }
   0xc   : > { %387 = vmatprep.subr.bf16.mxu0 (!%p139_p2), %v430_v1 }
   0xd   : > { %s501_s18 = smov (!%p163_p3, %s358_s18), 3 }
   0xe   : > { %s359_s21 = sshll.u32 %s501_s18, 2  ;;  %s361_s8 = sshll.u32 %s501_s18, 3 }
   0xf   : > { %s166_s24 = scalar_lea.vmem %s496_s0, %s359_s21  ;;  %388 = vmatpush3.bf16.msra.mxu0 %v415_v3  ;;  %s172_s14 = scalar_lea.vmem %s499_s3, %s361_s8 }
  0x10   : > { %389 = vmatprep.subr.bf16.mxu0 %v430_v1  ;;  %v421_v9 = vld [vmem:[%s166_s24] sm:$0xff]  }
  0x13   : > { %390 = vmatpush3.bf16.msra.mxu0 %v416_v4 }
  0x14   : > { %391 = vmatprep.subr.bf16.mxu0 %v430_v1 }
  0x17   : > { %392 = vmatpush3.bf16.msra.mxu0 %v417_v5 }
  0x18   : > { %393 = vmatprep.subr.bf16.mxu0 %v430_v1 }
  0x1b   : > { %394 = vmatpush3.bf16.msra.mxu0 %v418_v6 }
  0x1c   : > { %395 = vmatprep.subr.bf16.mxu0 %v430_v1 }
  0x1f   : > { %396 = vmatpush3.bf16.msra.mxu0 %v419_v7 }
  0x20   : > { %397 = vmatprep.subr.bf16.mxu0 %v430_v1 }
  0x23   : > { %398 = vmatpush3.bf16.msra.mxu0 %v420_v8 }
  0x26   : > { %400 = vmatmul.mubr.bf16.vlgmr.msra.gmra.mrb[0].mxu0 %v421_v9 }
  0xf9   : > { %v288_v11 = vpop.f32.mrb[0].mxu0 }
  0xfa   : > { %v289_v12 = vadd.f32 %v362_v10, %v288_v11  ;;  %v401_v13 = vpop.f32.mrb[1].mxu0 }
  0xfb   : > { %v291_v14 = vpop.f32.mrb[2].mxu0 }
  0xfc   : > { %295 = vst [vmem:[%s172_s14] sm:$0xff] %v289_v12  ;;  %v292_v15 = vadd.f32 %v362_v10, %v291_v14  ;;  %v402_v16 = vpop.f32.mrb[3].mxu0 }
  0xfe   : > { %296 = vst [vmem:[%s172_s14 + $0x8] sm:$0xff] %v292_v15 }
  0xff PF: > { %s13_s12 = sadd.s32 1, %s428_s12  }
 0x100   : > { %p10_p4 = scmp.ge.s32.totalorder %s13_s12, 4  }
 0x102   :  { %12 = sbr.rel (!%p10_p4) target bundleno = 1 (0x1), region = 62 }

// kernel: mlp_mixer_forward.5
= control target key start
LH: loop header
LB: loop body
LE: loop exit
PB: predicated region body
PF: predicated region fallthrough
CT: control target
= control target key end

     0   :  { %v22_v0 = vlaneseq  ;;  %s440_s0 = inlined_call_operand.vmem [shape: f32[32,128], index: 0, kind: input, shape index: {}]   ;;  %s441_s1 = inlined_call_operand.vmem [shape: f32[1,128], index: 1, kind: input, shape index: {}]   ;;  %s442_s2 = inlined_call_operand.vmem [shape: f32[1,128], index: 2, kind: input, shape index: {}]   ;;  %s443_s3 = inlined_call_operand.vmem [shape: bf16[128,128], index: 3, kind: input, shape index: {}]   ;;  %s444_s4 = inlined_call_operand.vmem [shape: f32[1,128], index: 4, kind: input, shape index: {}]   ;;  %s445_s5 = inlined_call_operand.hbm [shape: f32[1,2,128], index: 5, kind: output, shape index: {}]  }
   0x1   :  { %v25_v1 = vld [vmem:[%s440_s0] sm:$0xff]  ;;  %v27_v2 = vld [vmem:[%s440_s0 + $0x10] sm:$0xff]  ;;  %v26_v3 = vld [vmem:[%s440_s0 + $0x8] sm:$0xff] }
   0x2   :  { %v23_v4 = vand.u32 127, %v22_v0  ;;  %v28_v5 = vld [vmem:[%s440_s0 + $0x18] sm:$0xff] }
   0x4   :  { %vm24_vm0 = vcmp.lt.s32.totalorder %v23_v4, 32 }
   0x5   :  { %v33_v6 = vsel %vm24_vm0, %v25_v1, 0.0  ;;  %v35_v7 = vsel %vm24_vm0, %v27_v2, 0.0  ;;  %v34_v8 = vsel %vm24_vm0, %v26_v3, 0.0  ;;  %v36_v9 = vsel %vm24_vm0, %v28_v5, 0.0 }
   0x6   :  { %37 = vadd.xlane.f32.xlu0 %v33_v6  ;;  %41 = vadd.xlane.f32.xlu1 %v35_v7 }
   0x7   :  { %10 = vsyncpa [#allocation3], 0  ;;  %v292_v30 = vld [vmem:[%s443_s3] sm:$0xff]   ;;  %v332_v31 = vmov 0.0   ;;  %v293_v32 = vld [vmem:[%s443_s3 + $0x8] sm:$0xff]   ;;  %vm333_vm1 = vmmov 0  }
   0x8   :  { %269 = vmatprep.subr.bf16.mxu0 %v332_v31  ;;  %v294_v33 = vld [vmem:[%s443_s3 + $0x10] sm:$0xff]   ;;  %v295_v34 = vld [vmem:[%s443_s3 + $0x18] sm:$0xff]   ;;  %285 = vmatprep.mubr.msk.bf16.mxu0 %vm333_vm1, %v332_v31  ;;  %v296_v35 = vld [vmem:[%s443_s3 + $0x20] sm:$0xff]   ;;  %vm119_vm2 = vcmask 1040384   ;;  %s334_s19 = smov [#allocation2]  }
   0x9   :  { %270 = vmatpush3.bf16.msra.mxu0 %v292_v30  ;;  %v297_v36 = vld [vmem:[%s443_s3 + $0x28] sm:$0xff]   ;;  %v298_v37 = vld [vmem:[%s443_s3 + $0x30] sm:$0xff]   ;;  %v299_v38 = vld [vmem:[%s443_s3 + $0x38] sm:$0xff]   ;;  %s241_s20 = sshll.u32 %s334_s19, 4  ;;  %s242_s20 = int_to_ptr.vmem [resolvable:$true] %s241_s20 }
   0xa   :  { %39 = vadd.xlane.f32.xlu0 %v34_v8  ;;  %43 = vadd.xlane.f32.xlu1 %v36_v9  ;;  %v249_v53 = vld [vmem:[%s441_s1] ss:$0 sm:$0xff]  ;;  %s308_s21 = scalar_lea.vmem %s242_s20, 32  ;;  %p313_p1 = scmp.lt.s32.totalorder %s242_s20, %s242_s20 }
   0xb   :  { %271 = vmatprep.subr.bf16.mxu0 %v332_v31  ;;  %v250_v58 = vld [vmem:[%s442_s2] ss:$0 sm:$0xff]  ;;  %p309_p0 = scmp.ne.s32.totalorder %s242_s20, %s308_s21  ;;  %p314_p2 = scmp.lt.s32.totalorder %s308_s21, %s308_s21 }
   0xd   :  { %272 = vmatpush3.bf16.msra.mxu0 %v293_v32  ;;  %p315_p3 = por %p314_p2, %p313_p1 }
   0xe   :  { %273 = vmatprep.subr.bf16.mxu0 %v332_v31 }
   0xf   :  { %p316_p4 = pnand %p315_p3, %p309_p0 }
  0x11   :  { %274 = vmatpush3.bf16.msra.mxu0 %v294_v33 }
  0x12   :  { %275 = vmatprep.subr.bf16.mxu0 %v332_v31 }
  0x15   :  { %276 = vmatpush3.bf16.msra.mxu0 %v295_v34 }
  0x16   :  { %277 = vmatprep.subr.bf16.mxu0 %v332_v31 }
  0x19   :  { %278 = vmatpush3.bf16.msra.mxu0 %v296_v35 }
  0x1a   :  { %279 = vmatprep.subr.bf16.mxu0 %v332_v31 }
  0x1d   :  { %280 = vmatpush3.bf16.msra.mxu0 %v297_v36 }
  0x1e   :  { %281 = vmatprep.subr.bf16.mxu0 %v332_v31 }
  0x21   :  { %282 = vmatpush3.bf16.msra.mxu0 %v298_v37 }
  0x22   :  { %283 = vmatprep.subr.bf16.mxu0 %v332_v31 }
  0x25   :  { %284 = vmatpush3.bf16.msra.mxu0 %v299_v38 }
  0x93   :  { %v38_v10 = vpop.xlane.xlu0 %37  ;;  %v42_v11 = vpop.xlane.xlu1 %41 }
  0x94   :  { %v45_v12 = vmul.f32 0.03125, %v38_v10  ;;  %v47_v13 = vmul.f32 0.03125, %v42_v11 }
  0x96   :  { %v49_v14 = vsub.f32 %v25_v1, %v45_v12  ;;  %v51_v15 = vsub.f32 %v27_v2, %v47_v13 }
  0x97   :  { %v40_v16 = vpop.xlane.xlu0 %39  ;;  %v44_v17 = vpop.xlane.xlu1 %43 }
  0x98   :  { %v46_v18 = vmul.f32 0.03125, %v40_v16  ;;  %v48_v19 = vmul.f32 0.03125, %v44_v17  ;;  %v53_v20 = vsel %vm24_vm0, %v49_v14, 0.0  ;;  %v383_v21 = vsel %vm24_vm0, %v51_v15, 0.0 }
  0x99   :  { %v57_v22 = vmul.f32 %v53_v20, %v53_v20  ;;  %v59_v25 = vmul.f32 %v383_v21, %v383_v21 }
  0x9a   :  { %v50_v23 = vsub.f32 %v26_v3, %v46_v18  ;;  %v52_v24 = vsub.f32 %v28_v5, %v48_v19 }
  0x9b   :  { %61 = vadd.xlane.f32.xlu0 %v57_v22  ;;  %v251_v22 = vld [vmem:[%s444_s4] ss:$0 sm:$0xff] }
  0x9c   :  { %v54_v26 = vsel %vm24_vm0, %v50_v23, 0.0  ;;  %v389_v27 = vsel %vm24_vm0, %v52_v24, 0.0 }
  0x9d   :  { %v58_v28 = vmul.f32 %v54_v26, %v54_v26  ;;  %v60_v29 = vmul.f32 %v389_v27, %v389_v27 }
  0x9f   :  { %65 = vadd.xlane.f32.xlu0 %v59_v25  ;;  %63 = vadd.xlane.f32.xlu1 %v58_v28 }
  0xa3   :  { %67 = vadd.xlane.f32.xlu1 %v60_v29 }
 0x128   :  { %v62_v39 = vpop.xlane.xlu0 %61 }
 0x129   :  { %v69_v40 = vmul.f32 0.03125, %v62_v39 }
 0x12b   :  { %v73_v41 = vadd.f32 1e-05, %v69_v40 }
 0x12c   :  { %v64_v42 = vpop.xlane.xlu1 %63  ;;  %v66_v43 = vpop.xlane.xlu0 %65 }
 0x12d   :  { %300 = vrsqrt.f32 %v73_v41  ;;  %v70_v44 = vmul.f32 0.03125, %v64_v42  ;;  %v71_v45 = vmul.f32 0.03125, %v66_v43 }
 0x12f   :  { %v74_v46 = vadd.f32 1e-05, %v70_v44  ;;  %v75_v47 = vadd.f32 1e-05, %v71_v45 }
 0x130   :  { %v68_v48 = vpop.xlane.xlu1 %67 }
 0x131   :  { %302 = vrsqrt.f32 %v74_v46  ;;  %v72_v49 = vmul.f32 0.03125, %v68_v48 }
 0x132   :  { %304 = vrsqrt.f32 %v75_v47 }
 0x133   :  { %v76_v50 = vadd.f32 1e-05, %v72_v49 }
 0x135   :  { %306 = vrsqrt.f32 %v76_v50 }
 0x137   :  { %v301_v51 = vpop.eup %300 }
 0x138   :  { %v81_v52 = vmul.f32 %v301_v51, %v53_v20 }
 0x13a   :  { %v91_v56 = vmul.f32 %v249_v53, %v81_v52 }
 0x13b   :  { %v303_v54 = vpop.eup %302 }
 0x13c   :  { %v305_v55 = vpop.eup %304  ;;  %v82_v57 = vmul.f32 %v303_v54, %v54_v26  ;;  %v101_v62 = vadd.f32 %v250_v58, %v91_v56 }
 0x13d   :  { %v83_v59 = vmul.f32 %v305_v55, %v383_v21 }
 0x13e   :  { %v92_v60 = vmul.f32 %v249_v53, %v82_v57 }
 0x13f   :  { %v307_v61 = vpop.eup %306  ;;  %v93_v0 = vmul.f32 %v249_v53, %v83_v59 }
 0x140   :  { %v102_v63 = vadd.f32 %v250_v58, %v92_v60  ;;  %v84_v1 = vmul.f32 %v307_v61, %v389_v27 }
 0x141   :  { %v103_v4 = vadd.f32 %v250_v58, %v93_v0 }
 0x142   :  { %v94_v2 = vmul.f32 %v249_v53, %v84_v1  ;;  %v105_v3 = vadd.f32 %v102_v63, %v101_v62 }
 0x144   :  { %v104_v5 = vadd.f32 %v250_v58, %v94_v2  ;;  %v106_v6 = vrot.slane %v105_v3, 4 }
 0x146   :  { %v107_v7 = vadd.f32 %v106_v6, %v105_v3  ;;  %v112_v8 = vadd.f32 %v104_v5, %v103_v4 }
 0x148   :  { %v108_v9 = vrot.slane %v107_v7, 2  ;;  %v113_v10 = vrot.slane %v112_v8, 4 }
 0x14a   :  { %v109_v11 = vadd.f32 %v108_v9, %v107_v7  ;;  %v114_v12 = vadd.f32 %v113_v10, %v112_v8 }
 0x14c   :  { %v115_v13 = vrot.slane %v114_v12, 2  ;;  %v110_v14 = vrot.slane %v109_v11, 1 }
 0x14e   :  { %v116_v15 = vadd.f32 %v115_v13, %v114_v12  ;;  %v111_v17 = vadd.f32 %v110_v14, %v109_v11 }
 0x150   :  { %v117_v16 = vrot.slane %v116_v15, 1 }
 0x152   :  { %v118_v18 = vadd.f32 %v117_v16, %v116_v15 }
 0x154   :  { %v120_v19 = vsel %vm119_vm2, %v111_v17, %v118_v18 }
 0x155   :  { %v121_v20 = vmul.f32 0.0625, %v120_v19 }
 0x157   :  { %v122_v21 = vpack.c.bf16 %v121_v20, %v121_v20 }
 0x159   :  { %286 = vmatmul.mubr.bf16.vlgmr.msra.gmra.mrb[0].mxu0 %v122_v21 }
 0x22c   :  { %v228_v23 = vpop.f32.mrb[0].mxu0 }
 0x22d   :  { %v229_v24 = vadd.f32 %v251_v22, %v228_v23  ;;  %v287_v25 = vpop.f32.mrb[1].mxu0 }
 0x22e   :  { %v231_v26 = vpop.f32.mrb[2].mxu0 }
 0x22f   :  { %234 = vst [vmem:[#allocation2] sm:$0x3] %v229_v24  ;;  %v288_v27 = vpop.f32.mrb[3].mxu0 }
 0x230   :  { %319 = shalt.err (!%p316_p4)
}
 0x231   :  { %s320_s4 = scalar_lea.hbm %s445_s5, 32 }
 0x232   :  { %p321_p5 = scmp.ne.s32.totalorder %s445_s5, %s320_s4  ;;  %p324_p6 = scmp.lt.u32.totalorder %s320_s4, %s445_s5 }
 0x234   :  { %p326_p7 = pnand %p324_p6, %p321_p5 }
 0x236   :  { %329 = shalt.err (!%p326_p7)
}
 0x237   :  { %244 = dma.vmem_to_hbm [thread:$0]  %s242_s20, 32, %s445_s5, [#allocation3]  }
 0x238   :  { %330 = dma.done.wait [#allocation3], 32  }
 0x239   :  { %331 = vsyncadd [#allocation3], 4294967264 }
 0x23a   :  { %248 = vsyncpa [#allocation3], 1 }

// kernel: mlp_mixer_forward.4
= control target key start
LH: loop header
LB: loop body
LE: loop exit
PB: predicated region body
PF: predicated region fallthrough
CT: control target
= control target key end

     0   :  { %s1664_s25 = smov 0   ;;  %s1666_s26 = smov 0   ;;  %s1906_s0 = inlined_call_operand.vmem [shape: f32[32,128], index: 0, kind: input, shape index: {}]   ;;  %s1907_s1 = inlined_call_operand.vmem [shape: f32[2,1,128], index: 1, kind: input, shape index: {}]   ;;  %s1908_s2 = inlined_call_operand.vmem [shape: f32[2,1,128], index: 2, kind: input, shape index: {}]   ;;  %s1909_s3 = inlined_call_operand.vmem [shape: bf16[2,16,16], index: 3, kind: input, shape index: {}]   ;;  %s1910_s4 = inlined_call_operand.vmem [shape: f32[2,16,1], index: 4, kind: input, shape index: {}]   ;;  %s1911_s5 = inlined_call_operand.vmem [shape: bf16[2,16,16], index: 5, kind: input, shape index: {}]   ;;  %s1912_s6 = inlined_call_operand.vmem [shape: f32[2,16,1], index: 6, kind: input, shape index: {}]   ;;  %s1913_s7 = inlined_call_operand.vmem [shape: f32[2,1,128], index: 7, kind: input, shape index: {}]   ;;  %s1914_s8 = inlined_call_operand.vmem [shape: f32[2,1,128], index: 8, kind: input, shape index: {}]   ;;  %s1915_s9 = inlined_call_operand.vmem [shape: bf16[2,128,128], index: 9, kind: input, shape index: {}]   ;;  %s1916_s10 = inlined_call_operand.vmem [shape: f32[2,1,128], index: 10, kind: input, shape index: {}]   ;;  %s1917_s11 = inlined_call_operand.vmem [shape: bf16[2,128,128], index: 11, kind: input, shape index: {}]   ;;  %s1918_s12 = inlined_call_operand.vmem [shape: f32[2,1,128], index: 12, kind: input, shape index: {}]   ;;  %s1919_s13 = inlined_call_operand.vmem [shape: f32[32,128], index: 13, kind: output, shape index: {}]  }
   0x1   :  { %1924 = sst [smem:[#allocation9_spill]] %s1906_s0  ;;  %s1668_s27 = smov 0  }
   0x2   :  { %1925 = sst [smem:[#allocation10_spill]] %s1909_s3  ;;  %s1670_s28 = smov 0  }
   0x3   :  { %1926 = sst [smem:[#allocation11_spill]] %s1910_s4  ;;  %s1672_s29 = smov 0  }
   0x4   :  { %1927 = sst [smem:[#allocation12_spill]] %s1911_s5 }
   0x5   :  { %1928 = sst [smem:[#allocation13_spill]] %s1912_s6 }
   0x6   :  { %1929 = sst [smem:[#allocation14_spill]] %s1919_s13 }
   0x7 LB: > { %1930 = sst [smem:[#allocation2_spill]] %s1573_s25  ;;  %s32_s30 = sadd.s32 1, %s1581_s27  ;;  %s1589_s29 = sphi %s1672_s29, %s23_s29   ;;  %s1585_s28 = sphi %s1670_s28, %s1953_s28   ;;  %s1581_s27 = sphi %s1668_s27, %s1952_s27   ;;  %s1577_s26 = sphi %s1666_s26, %s1951_s26   ;;  %s1573_s25 = sphi %s1664_s25, %s1950_s25  }
   0x8   : > { %1931 = sst [smem:[#allocation3_spill]] %s1581_s27  ;;  %s35_s14 = sadd.s32 1, %s1585_s28 }
   0x9   : > { %1932 = sst [smem:[#allocation4_spill]] %s1585_s28  ;;  %p33_p0 = scmp.ge.s32.totalorder %s32_s30, 2 }
   0xa   : > { %1933 = sst [smem:[#allocation5_spill]] %s1589_s29  ;;  %p1346_p1 = scmp.ge.s32.totalorder %s1589_s29, 1 }
   0xb   : > { %p508_p2 = scmp.lt.s32.totalorder %s1589_s29, 5  ;;  %s1955_s30 = smov (%p33_p0, %s32_s30), 0 }
   0xc   : > { %1934 = sst [smem:[#allocation6_spill]] %s1955_s30  ;;  %s1957_s14 = smov (!%p33_p0, %s35_s14), %s1585_s28 }
   0xd   : > { %p509_p3 = pnand %p1346_p1, %p508_p2  ;;  %p37_p4 = scmp.ge.s32.totalorder %s1957_s14, 2 }
   0xf   : > { %s1959_s14 = smov (%p37_p4, %s1957_s14), 0  ;;  %512 = sbr.rel (%p509_p3) target bundleno = 1606 (0x646), region = 72 }
  0x10   : > { %1935 = sst [smem:[#allocation7_spill]] %s1959_s14 }
  0x16   : > { %s1347_s15 = sshll.u32 %s1577_s26, 1  ;;  %p606_p5 = scmp.lt.s32.totalorder %s1573_s25, 1 }
  0x17   : > { %p601_p6 = scmp.lt.s32.totalorder %s1347_s15, 3  ;;  %s1936_s0 = sld [smem:[#allocation9_spill]] }
  0x18   : > { %s1698_s16 = scalar_select %p606_p5, %s1573_s25, 1 }
  0x19   : > { %s1961_s15 = smov (!%p601_p6, %s1347_s15), 3  ;;  %s1937_s3 = sld [smem:[#allocation10_spill]] }
  0x1a   : > { %s1348_s23 = sshll.u32 %s1961_s15, 3  ;;  %s1392_s24 = sshll.u32 %s1698_s16, 3 }
  0x1b   : > { %s1393_s25 = sshll.u32 %s1698_s16, 4  ;;  %s1938_s5 = sld [smem:[#allocation12_spill]] }
  0x1c   : > { %s1940_s4 = sld [smem:[#allocation11_spill]]  ;;  %s1941_s6 = sld [smem:[#allocation13_spill]] }
  0x1d   : > { %s604_s30 = scalar_lea.vmem %s1936_s0, %s1348_s23  ;;  %s645_s20 = scalar_lea.vmem %s1916_s10, %s1698_s16 }
  0x1e   : > { %s653_s0 = scalar_lea.vmem %s1918_s12, %s1698_s16  ;;  %s1942_s28 = sld [smem:[#allocation14_spill]] }
  0x1f   : > { %s1715_s29 = scalar_lea.vmem %s1937_s3, %s1392_s24 }
  0x21   : > { %s1721_s18 = scalar_lea.vmem %s1938_s5, %s1392_s24  ;;  %s1396_s24 = sshll.u32 %s1698_s16, 6 }
  0x22   : > { %1939 = sst [smem:[#allocation8_spill]] %s1721_s18  ;;  %s1726_s15 = scalar_lea.vmem %s1940_s4, %s1393_s25 }
  0x23   : > { %s1731_s14 = scalar_lea.vmem %s1941_s6, %s1393_s25  ;;  %s1749_s18 = scalar_lea.vmem %s1915_s9, %s1396_s24 }
  0x24   : > { %s1754_s22 = scalar_lea.vmem %s1917_s11, %s1396_s24  ;;  %s1763_s6 = scalar_lea.vmem %s1942_s28, %s1348_s23 }
  0x25   : > { %s1943_s5 = sld [smem:[#allocation2_spill]] }
  0x2b   : > { %p1363_p7 = scmp.ne.s32.totalorder %s1943_s5, 0 }
  0x2c   : > { %v665_v0 = vld [vmem:[%s604_s30] sm:$0xff] (!%p1363_p7)  ;;  %v666_v1 = vld [vmem:[%s604_s30 + $0x8] sm:$0xff] (!%p1363_p7) }
  0x2d   : > { %664 = sbr.rel (%p1363_p7) target bundleno = 52 (0x34), region = 76  ;;  %667 = vst [vmem:[%s1763_s6] sm:$0xff] (!%p1363_p7), %v665_v0  ;;  %668 = vst [vmem:[%s1763_s6 + $0x8] sm:$0xff] (!%p1363_p7), %v666_v1 }
  0x34 PF: > { %v669_v2 = vlaneseq  ;;  %v1769_v3 = vld [vmem:[%s1763_s6] sm:$0xff]  ;;  %v1774_v5 = vld [vmem:[%s1763_s6 + $0x8] sm:$0xff]  ;;  %v1591_v18 = vmov 0.0   ;;  %vm1592_vm1 = vmmov 0   ;;  %v1593_v21 = vmov 0   ;;  %s1944_s23 = scalar_lea.vmem %s1907_s1, %s1698_s16  ;;  %s1945_s28 = scalar_lea.vmem %s1908_s2, %s1698_s16 }
  0x35   : > { %1420 = vmatprep.subr.bf16.mxu0 %v1591_v18  ;;  %1426 = vmatprep.subr.bf16.mxu1 %v1591_v18  ;;  %v724_v19 = vld [vmem:[%s1726_s15 + $0x8] sm:$0xff]  ;;  %v723_v20 = vld [vmem:[%s1726_s15] sm:$0xff]  ;;  %vm740_vm2 = vcmask 130048   ;;  %s1946_s13 = sld [smem:[#allocation8_spill]]  ;;  %s1947_s24 = scalar_lea.vmem %s1913_s7, %s1698_s16 }
  0x36   : > { %v1771_v4 = vand.u32 127, %v669_v2  ;;  %1422 = vmatprep.mubr.msk.bf16.mxu0 %vm1592_vm1, %v1591_v18  ;;  %1428 = vmatprep.mubr.msk.bf16.mxu1 %vm1592_vm1, %v1591_v18  ;;  %v799_v22 = vld [vmem:[%s1731_s14] sm:$0xff]  ;;  %v800_v23 = vld [vmem:[%s1731_s14 + $0x8] sm:$0xff]  ;;  %s1948_s25 = scalar_lea.vmem %s1914_s8, %s1698_s16 }
  0x37   : > { %1516 = vset.pattern.permute.xlu1 %v1593_v21  ;;  %1515 = vset.pattern.permute.xlu0 %v1593_v21  ;;  %v1364_v32 = vld [vmem:[%s1944_s23] ss:$0 sm:$0xff] }
  0x38   : > { %vm671_vm0 = vcmp.lt.s32.totalorder %v1771_v4, 32  ;;  %v1365_v36 = vld [vmem:[%s1945_s28] ss:$0 sm:$0xff] }
  0x39   : > { %v678_v6 = vsel %vm671_vm0, %v1769_v3, 0.0  ;;  %v679_v7 = vsel %vm671_vm0, %v1774_v5, 0.0  ;;  %v1517_v41 = vld [vmem:[%s1715_s29] sm:$0xff]  }
  0x3a   : > { %680 = vadd.xlane.f32.xlu0 %v678_v6  ;;  %v1523_v4 = vld [vmem:[%s1749_s18 + $0x20] sm:$0xff]  }
  0x3b   : > { %v1518_v61 = vld [vmem:[%s1946_s13] sm:$0xff]  }
  0x3e   : > { %682 = vadd.xlane.f32.xlu0 %v679_v7 }
  0x54   : > { %727 = vperm.xlu0 %1515, %v723_v20  }
  0xc7   : > { %v681_v8 = vpop.xlane.xlu0 %680 }
  0xc8   : > { %v684_v9 = vmul.f32 0.03125, %v681_v8 }
  0xca   : > { %v686_v10 = vsub.f32 %v1769_v3, %v684_v9 }
  0xcb   : > { %v683_v11 = vpop.xlane.xlu0 %682 }
  0xcc   : > { %v685_v12 = vmul.f32 0.03125, %v683_v11  ;;  %v688_v13 = vsel %vm671_vm0, %v686_v10, 0.0 }
  0xcd   : > { %v690_v14 = vmul.f32 %v688_v13, %v688_v13 }
  0xce   : > { %v687_v15 = vsub.f32 %v1774_v5, %v685_v12 }
  0xcf   : > { %692 = vadd.xlane.f32.xlu1 %v690_v14 }
  0xd0   : > { %v689_v16 = vsel %vm671_vm0, %v687_v15, 0.0 }
  0xd1   : > { %v691_v17 = vmul.f32 %v689_v16, %v689_v16 }
  0xd3   : > { %694 = vadd.xlane.f32.xlu1 %v691_v17  ;;  %v728_v42 = vpop.permute.xlu0 %727 }
  0xe4   : > { %732 = vperm.xlu1 %1516, %v724_v19  }
  0xe8   : > { %803 = vperm.xlu1 %1516, %v799_v22  }
  0xec   : > { %808 = vperm.xlu1 %1516, %v800_v23   ;;  %v1520_v23 = vld [vmem:[%s1749_s18 + $0x8] sm:$0xff]  }
 0x15c   : > { %v693_v24 = vpop.xlane.xlu1 %692 }
 0x15d   : > { %v696_v25 = vmul.f32 0.03125, %v693_v24  ;;  %v1521_v24 = vld [vmem:[%s1749_s18 + $0x10] sm:$0xff]  }
 0x15f   : > { %v698_v26 = vadd.f32 1e-05, %v696_v25  ;;  %v1522_v25 = vld [vmem:[%s1749_s18 + $0x18] sm:$0xff]  }
 0x160   : > { %v695_v27 = vpop.xlane.xlu1 %694 }
 0x161   : > { %1535 = vrsqrt.f32 %v698_v26  ;;  %v697_v28 = vmul.f32 0.03125, %v695_v27  ;;  %v1524_v26 = vld [vmem:[%s1749_s18 + $0x28] sm:$0xff]   ;;  %v1525_v27 = vld [vmem:[%s1749_s18 + $0x30] sm:$0xff]  }
 0x163   : > { %v699_v29 = vadd.f32 1e-05, %v697_v28  ;;  %v1526_v28 = vld [vmem:[%s1749_s18 + $0x38] sm:$0xff]  }
 0x164   : > { %v733_v46 = vpop.permute.xlu1 %732 }
 0x165   : > { %1537 = vrsqrt.f32 %v699_v29  ;;  %v1527_v29 = vld [vmem:[%s1754_s22] sm:$0xff]  }
 0x168   : > { %v804_v62 = vpop.permute.xlu1 %803 }
 0x16b   : > { %v1536_v30 = vpop.eup %1535 }
 0x16c   : > { %v702_v31 = vmul.f32 %v1536_v30, %v688_v13  ;;  %v809_v2 = vpop.permute.xlu1 %808  ;;  %v1519_v13 = vld [vmem:[%s1749_s18] sm:$0xff]   ;;  %v1528_v30 = vld [vmem:[%s1754_s22 + $0x8] sm:$0xff]  }
 0x16e   : > { %v710_v35 = vmul.f32 %v1364_v32, %v702_v31 }
 0x16f   : > { %v1538_v33 = vpop.eup %1537 }
 0x170   : > { %v703_v34 = vmul.f32 %v1538_v33, %v689_v16  ;;  %v718_v38 = vadd.f32 %v1365_v36, %v710_v35 }
 0x172   : > { %v711_v37 = vmul.f32 %v1364_v32, %v703_v34 }
 0x174   : > { %v719_v39 = vadd.f32 %v1365_v36, %v711_v37 }
 0x176   : > { %v720_v40 = vpack.c.bf16 %v719_v39, %v718_v38  ;;  %v1370_v39 = vld [vmem:[%s1947_s24] ss:$0 sm:$0xff] }
 0x178   : > { %1421 = vmatpush3.bf16.msra.mxu0 %v720_v40 }
 0x179   : > { %1432 = vmatprep.subr.bf16.mxu0 %v1591_v18 }
 0x17b   : > { %1423 = vmatmul.mubr.msk.bf16.vlgmr.msra.gmra.mrb[0].mxu0 %vm740_vm2, %v1517_v41 }
 0x17c   : > { %1448 = vmatprep.mubr.msk.bf16.mxu0 %vm1592_vm1, %v1591_v18  ;;  %1433 = vmatpush3.bf16.msra.mxu0 %v1519_v13  ;;  %v1389_v13 = vld [vmem:[%s653_s0] ss:$0 sm:$0xff] }
 0x17d   : > { %1434 = vmatprep.subr.bf16.mxu0 %v1591_v18 }
 0x180   : > { %1435 = vmatpush3.bf16.msra.mxu0 %v1520_v23 }
 0x181   : > { %1436 = vmatprep.subr.bf16.mxu0 %v1591_v18 }
 0x184   : > { %1437 = vmatpush3.bf16.msra.mxu0 %v1521_v24 }
 0x185   : > { %1438 = vmatprep.subr.bf16.mxu0 %v1591_v18 }
 0x188   : > { %1439 = vmatpush3.bf16.msra.mxu0 %v1522_v25 }
 0x189   : > { %1440 = vmatprep.subr.bf16.mxu0 %v1591_v18 }
 0x18c   : > { %1441 = vmatpush3.bf16.msra.mxu0 %v1523_v4 }
 0x18d   : > { %1442 = vmatprep.subr.bf16.mxu0 %v1591_v18 }
 0x190   : > { %1443 = vmatpush3.bf16.msra.mxu0 %v1524_v26 }
 0x191   : > { %1444 = vmatprep.subr.bf16.mxu0 %v1591_v18 }
 0x194   : > { %1445 = vmatpush3.bf16.msra.mxu0 %v1525_v27 }
 0x195   : > { %1446 = vmatprep.subr.bf16.mxu0 %v1591_v18 }
 0x198   : > { %1447 = vmatpush3.bf16.msra.mxu0 %v1526_v28 }
 0x24e   : > { %v778_v43 = vpop.f32.mrb[0].mxu0 }
 0x24f   : > { %v779_v44 = vadd.f32 %v778_v43, %v728_v42  ;;  %v1424_v45 = vpop.f32.mrb[1].mxu0  ;;  %v1371_v43 = vld [vmem:[%s1948_s25] ss:$0 sm:$0xff] }
 0x250   : > { %v781_v47 = vpop.f32.mrb[2].mxu0 }
 0x251   : > { %v788_v48 = vmul.f32 0.70710677, %v779_v44  ;;  %v782_v49 = vadd.f32 %v781_v47, %v733_v46  ;;  %v1425_v50 = vpop.f32.mrb[3].mxu0  ;;  %v785_v55 = vmul.f32 0.5, %v779_v44 }
 0x252   : > { %v1531_v50 = vld [vmem:[%s1754_s22 + $0x20] sm:$0xff]  }
 0x253   : > { %1539 = verf.f32 %v788_v48  ;;  %v789_v51 = vmul.f32 0.70710677, %v782_v49  ;;  %v786_v56 = vmul.f32 0.5, %v782_v49  ;;  %v1529_v48 = vld [vmem:[%s1754_s22 + $0x10] sm:$0xff]   ;;  %v1530_v49 = vld [vmem:[%s1754_s22 + $0x18] sm:$0xff]  }
 0x255   : > { %1541 = verf.f32 %v789_v51  ;;  %v1532_v51 = vld [vmem:[%s1754_s22 + $0x28] sm:$0xff]  }
 0x25d   : > { %v1540_v52 = vpop.eup %1539 }
 0x25e   : > { %v792_v53 = vadd.f32 1.0, %v1540_v52  ;;  %v1533_v52 = vld [vmem:[%s1754_s22 + $0x30] sm:$0xff]  }
 0x25f   : > { %v1542_v54 = vpop.eup %1541 }
 0x260   : > { %v793_v57 = vadd.f32 1.0, %v1542_v54  ;;  %v794_v58 = vmul.f32 %v792_v53, %v785_v55  ;;  %v1534_v53 = vld [vmem:[%s1754_s22 + $0x38] sm:$0xff]   ;;  %v1372_v54 = vld [vmem:[%s645_s20] ss:$0 sm:$0xff] }
 0x262   : > { %v795_v59 = vmul.f32 %v793_v57, %v786_v56 }
 0x264   : > { %v796_v60 = vpack.c.bf16 %v795_v59, %v794_v58 }
 0x266   : > { %1427 = vmatpush3.bf16.msra.mxu1 %v796_v60 }
 0x267   : > { %1452 = vmatprep.subr.bf16.mxu1 %v1591_v18 }
 0x269   : > { %1429 = vmatmul.mubr.msk.bf16.vlgmr.msra.gmra.mrb[0].mxu1 %vm740_vm2, %v1518_v61 }
 0x26a   : > { %1468 = vmatprep.mubr.msk.bf16.mxu1 %vm1592_vm1, %v1591_v18  ;;  %1453 = vmatpush3.bf16.msra.mxu1 %v1527_v29 }
 0x26b   : > { %1454 = vmatprep.subr.bf16.mxu1 %v1591_v18 }
 0x26e   : > { %1455 = vmatpush3.bf16.msra.mxu1 %v1528_v30 }
 0x26f   : > { %1456 = vmatprep.subr.bf16.mxu1 %v1591_v18 }
 0x272   : > { %1457 = vmatpush3.bf16.msra.mxu1 %v1529_v48 }
 0x273   : > { %1458 = vmatprep.subr.bf16.mxu1 %v1591_v18 }
 0x276   : > { %1459 = vmatpush3.bf16.msra.mxu1 %v1530_v49 }
 0x277   : > { %1460 = vmatprep.subr.bf16.mxu1 %v1591_v18 }
 0x27a   : > { %1461 = vmatpush3.bf16.msra.mxu1 %v1531_v50 }
 0x27b   : > { %1462 = vmatprep.subr.bf16.mxu1 %v1591_v18 }
 0x27e   : > { %1463 = vmatpush3.bf16.msra.mxu1 %v1532_v51 }
 0x27f   : > { %1464 = vmatprep.subr.bf16.mxu1 %v1591_v18 }
 0x282   : > { %1465 = vmatpush3.bf16.msra.mxu1 %v1533_v52 }
 0x283   : > { %1466 = vmatprep.subr.bf16.mxu1 %v1591_v18 }
 0x286   : > { %1467 = vmatpush3.bf16.msra.mxu1 %v1534_v53 }
 0x33c   : > { %v853_v63 = vpop.f32.mrb[0].mxu1 }
 0x33d   : > { %v854_v0 = vadd.f32 %v853_v63, %v804_v62  ;;  %v1430_v1 = vpop.f32.mrb[1].mxu1 }
 0x33e   : > { %v856_v6 = vpop.f32.mrb[2].mxu1 }
 0x33f   : > { %v1820_v7 = vadd.f32 %v854_v0, %v1769_v3  ;;  %v857_v8 = vadd.f32 %v856_v6, %v809_v2  ;;  %v1431_v9 = vpop.f32.mrb[3].mxu1 }
 0x341   : > { %v1823_v10 = vadd.f32 %v857_v8, %v1774_v5  ;;  %v864_v11 = vsel %vm671_vm0, %v1820_v7, 0.0 }
 0x342   : > { %866 = vadd.xlane.f32.xlu1 %v864_v11 }
 0x343   : > { %v865_v12 = vsel %vm671_vm0, %v1823_v10, 0.0 }
 0x344   : > { %868 = vadd.xlane.f32.xlu0 %v865_v12 }
 0x3cf   : > { %v867_v3 = vpop.xlane.xlu1 %866 }
 0x3d0   : > { %v870_v14 = vmul.f32 0.03125, %v867_v3 }
 0x3d1   : > { %v869_v5 = vpop.xlane.xlu0 %868 }
 0x3d2   : > { %v872_v15 = vsub.f32 %v1820_v7, %v870_v14  ;;  %v871_v16 = vmul.f32 0.03125, %v869_v5 }
 0x3d4   : > { %v873_v17 = vsub.f32 %v1823_v10, %v871_v16  ;;  %v874_v19 = vsel %vm671_vm0, %v872_v15, 0.0 }
 0x3d5   : > { %v876_v20 = vmul.f32 %v874_v19, %v874_v19 }
 0x3d6   : > { %v875_v21 = vsel %vm671_vm0, %v873_v17, 0.0 }
 0x3d7   : > { %878 = vadd.xlane.f32.xlu1 %v876_v20  ;;  %v877_v22 = vmul.f32 %v875_v21, %v875_v21 }
 0x3db   : > { %880 = vadd.xlane.f32.xlu1 %v877_v22 }
 0x464   : > { %v879_v31 = vpop.xlane.xlu1 %878 }
 0x465   : > { %v882_v32 = vmul.f32 0.03125, %v879_v31 }
 0x467   : > { %v884_v33 = vadd.f32 1e-05, %v882_v32 }
 0x468   : > { %v881_v34 = vpop.xlane.xlu1 %880 }
 0x469   : > { %1543 = vrsqrt.f32 %v884_v33  ;;  %v883_v35 = vmul.f32 0.03125, %v881_v34 }
 0x46b   : > { %v885_v36 = vadd.f32 1e-05, %v883_v35 }
 0x46d   : > { %1545 = vrsqrt.f32 %v885_v36 }
 0x473   : > { %v1544_v37 = vpop.eup %1543 }
 0x474   : > { %v888_v38 = vmul.f32 %v1544_v37, %v874_v19 }
 0x476   : > { %v896_v42 = vmul.f32 %v1370_v39, %v888_v38 }
 0x477   : > { %v1546_v40 = vpop.eup %1545 }
 0x478   : > { %v889_v41 = vmul.f32 %v1546_v40, %v875_v21  ;;  %v904_v45 = vadd.f32 %v1371_v43, %v896_v42 }
 0x47a   : > { %v897_v44 = vmul.f32 %v1370_v39, %v889_v41 }
 0x47c   : > { %v905_v46 = vadd.f32 %v1371_v43, %v897_v44 }
 0x47e   : > { %v906_v47 = vpack.c.bf16 %v905_v46, %v904_v45 }
 0x480   : > { %1449 = vmatmul.mubr.bf16.vlgmr.msra.gmra.mrb[4].mxu0 %v906_v47 }
 0x553   : > { %v1012_v55 = vpop.f32.mrb[4].mxu0 }
 0x554   : > { %v1013_v56 = vadd.f32 %v1372_v54, %v1012_v55  ;;  %v1450_v57 = vpop.f32.mrb[5].mxu0 }
 0x555   : > { %v1015_v58 = vpop.f32.mrb[6].mxu0 }
 0x556   : > { %v1021_v59 = vmul.f32 0.70710677, %v1013_v56  ;;  %v1016_v60 = vadd.f32 %v1372_v54, %v1015_v58  ;;  %v1451_v61 = vpop.f32.mrb[7].mxu0  ;;  %v1019_v1 = vmul.f32 0.5, %v1013_v56 }
 0x558   : > { %1547 = verf.f32 %v1021_v59  ;;  %v1022_v62 = vmul.f32 0.70710677, %v1016_v60  ;;  %v1020_v2 = vmul.f32 0.5, %v1016_v60 }
 0x55a   : > { %1549 = verf.f32 %v1022_v62 }
 0x562   : > { %v1548_v63 = vpop.eup %1547 }
 0x563   : > { %v1025_v18 = vadd.f32 1.0, %v1548_v63 }
 0x564   : > { %v1550_v0 = vpop.eup %1549 }
 0x565   : > { %v1026_v6 = vadd.f32 1.0, %v1550_v0  ;;  %v1027_v8 = vmul.f32 %v1025_v18, %v1019_v1 }
 0x567   : > { %v1028_v9 = vmul.f32 %v1026_v6, %v1020_v2 }
 0x569   : > { %v1029_v11 = vpack.c.bf16 %v1028_v9, %v1027_v8 }
 0x56b   : > { %1469 = vmatmul.mubr.bf16.vlgmr.msra.gmra.mrb[4].mxu1 %v1029_v11 }
 0x63e   : > { %v1128_v12 = vpop.f32.mrb[4].mxu1 }
 0x63f   : > { %v1135_v3 = vadd.f32 %v1128_v12, %v1820_v7  ;;  %v1470_v14 = vpop.f32.mrb[5].mxu1 }
 0x640   : > { %v1131_v5 = vpop.f32.mrb[6].mxu1 }
 0x641   : > { %v1144_v15 = vadd.f32 %v1389_v13, %v1135_v3  ;;  %v1136_v16 = vadd.f32 %v1131_v5, %v1823_v10  ;;  %v1471_v17 = vpop.f32.mrb[7].mxu1 }
 0x643   : > { %1146 = vst [vmem:[%s1763_s6] sm:$0xff] %v1144_v15  ;;  %v1145_v19 = vadd.f32 %v1389_v13, %v1136_v16 }
 0x645   : > { %1147 = vst [vmem:[%s1763_s6 + $0x8] sm:$0xff] %v1145_v19 }
 0x646 PF: > { %s1949_s27 = sld [smem:[#allocation5_spill]]  ;;  %s1950_s25 = sld [smem:[#allocation3_spill]] }
 0x647   : > { %s1951_s26 = sld [smem:[#allocation4_spill]]  ;;  %s1953_s28 = sld [smem:[#allocation7_spill]] }
 0x64c   : > { %s23_s29 = sadd.s32 1, %s1949_s27   ;;  %s1952_s27 = sld [smem:[#allocation6_spill]] }
 0x64d   : > { %p20_p8 = scmp.ge.s32.totalorder %s23_s29, 6  }
 0x64f   :  { %22 = sbr.rel (!%p20_p8) target bundleno = 7 (0x7), region = 142 }

</bundles_post_ra>
